<compile_context>
chip_gen: v7x
topology: tpu7x:2x2x1
jax: 0.10.0
libtpu: 0.0.40
codegen_flags: <defaults>
</compile_context>

<pallas_src>
import functools
import numpy as np
import jax
import jax.numpy as jnp
from jax.experimental import pallas as pl
from jax.experimental.pallas import tpu as pltpu


def _ru8(n):
    return ((int(n) + 7) // 8) * 8


# --------------------------------------------------------------------------- fused kernel
def fused_lattn_kernel(x_ref,        # VMEM [B_blk, T_pad, d_model]   (compute dtype)
                       mask_ref,     # VMEM [B_blk, T_pad, 1]         additive 0 / -1e30 (f32)
                       qe_ref,       # VMEM [B_blk, 128, 128]         per-slot query stack
                       wkv_ref,      # VMEM [d_model, 128]            W_IN @ (K|V weights)
                       slab_ref,     # VMEM [rows, 64]                {W_XR | W_PR | LN_V | W2}
                       w1_ref,       # VMEM [64, d_hid]               block-diag FF W1
                       b1_ref,       # VMEM [1, d_hid]  f32
                       b2_ref,       # VMEM [1, 64]     f32
                       out_ref,      # VMEM [B_blk, T_pad, 64]  f32
                       *, B_blk, T_pad, d_model, d_kv, ff_dim, d_hid,
                       off_xr, off_pr, off_lnv, off_w2):
    N = B_blk * T_pad
    cdt = wkv_ref.dtype                            # MXU operand dtype (bf16 in perf config)

    x = x_ref[...].reshape(N, d_model)             # free merge: T_pad % 8 == 0

    # fused input projection + all-label K|V projection (W_IN folded host-side)
    kv = jnp.dot(x, wkv_ref[...], preferred_element_type=jnp.float32)        # [N, 128] f32

    # residual path folded end-to-end:  x_raw @ W_IN @ tile(wr) @ LN_C
    w_xr = slab_ref[off_xr:off_xr + d_model, :]
    xr = jnp.dot(x, w_xr, preferred_element_type=jnp.float32)                # [N, 64]  f32

    # label-attention scores, lane-dense (E_EXP and 1/temper folded into QE)
    kv3 = kv.reshape(B_blk, T_pad, d_kv)
    scores = jnp.einsum('btk,bkd->btd', kv3.astype(cdt), qe_ref[...],
                        preferred_element_type=jnp.float32)                  # [B, T, 128]
    scores = scores + mask_ref[...]                # -1e30 on padded tokens

    # masked softmax over the token axis; normalization deferred to after the reduction.
    # exp(-1e30 - m) underflows to 0 for any sentence with >=1 valid token; fully padded
    # batch slots give finite garbage that is sliced away host-side.
    m = jnp.max(scores, axis=1, keepdims=True)                               # [B, 1, 128]
    e = jnp.exp(scores - m)
    s = jnp.sum(e, axis=1, keepdims=True)                                    # [B, 1, 128]
    ctx = (jnp.sum(e * kv3, axis=1, keepdims=True)
           * pl.reciprocal(jnp.maximum(s, 1e-30), approx=True))              # [B, 1, 128]

    # (ctx @ wp @ wr + x @ wr), pre-centered per label (LN_C folded into both weights).
    # K-column garbage in ctx is annihilated by the exactly-zero K rows of w_pr.
    ctx_b = jnp.broadcast_to(ctx, (B_blk, T_pad, d_kv)).reshape(N, d_kv)
    w_pr = slab_ref[off_pr:off_pr + d_kv, :]
    zc = jnp.dot(ctx_b.astype(cdt), w_pr, preferred_element_type=jnp.float32) + xr  # [N,64]

    # per-label LayerNorm: unbiased block variance via matmul (f32), eps added to sigma,
    # affine params are identity at init.
    ln_v = slab_ref[off_lnv:off_lnv + ff_dim, :].astype(jnp.float32)
    var = jnp.dot(zc * zc, ln_v, preferred_element_type=jnp.float32)
    la = zc * pl.reciprocal(jnp.sqrt(var) + 1e-3, approx=True)               # [N, 64]

    # partitioned feed-forward (block-diagonal weights) + residual + final LayerNorm
    w2 = slab_ref[off_w2:off_w2 + d_hid, :]
    h = jnp.maximum(jnp.dot(la.astype(cdt), w1_ref[...],
                            preferred_element_type=jnp.float32) + b1_ref[...], 0.0)
    z = jnp.dot(h.astype(cdt), w2, preferred_element_type=jnp.float32) + b2_ref[...] + la
    mu = jnp.mean(z, axis=-1, keepdims=True)
    zc2 = z - mu
    sigma = jnp.sqrt(jnp.sum(zc2 * zc2, axis=-1, keepdims=True) / (ff_dim - 1))
    out = zc2 * pl.reciprocal(sigma + 1e-3, approx=True)

    out_ref[...] = out.reshape(B_blk, T_pad, ff_dim)        # free split: T_pad % 8 == 0
    # TODO(synk): the 64-wide output store is a masked partial store on v5e; packing two
    # tokens per 128-lane row was skipped to avoid an in-kernel sublane->lane relayout.


# --------------------------------------------------------------------------- host-side weight folding
def build_fused_weights(params, *, mb, B_blk, d_model, d_positional, d_l, d_k, d_v,
                        d_proj, compute_dtype):
    f64 = np.float64
    wr = np.asarray(params['wr'], f64)                      # [d_in, d_proj]
    d_in = wr.shape[0]
    d_cont_raw = d_model - d_positional
    d_cont_la = d_in - d_positional
    ff_dim = d_l * d_proj
    d_kv = d_l * (d_k + d_v)
    temper = float(np.sqrt(d_in))    # ScaledDotProductAttention(d_model=d_input)

    w_in = np.asarray(params['w_in'], f64)
    wk = np.asarray(params['wk_full'], f64)                 # [d_l, d_in, d_k]
    wv = np.asarray(params['wv_full'], f64)                 # [d_l, d_in, d_v]
    wq = np.asarray(params['wq_full'], f64)                 # [d_l, d_k]
    wp = np.asarray(params['wp_full'], f64)                 # [d_v, d_in]

    # input projection as a block matrix (content proj | positional identity)
    W_IN = np.zeros((d_model, d_in), f64)
    W_IN[:d_cont_raw, :d_cont_la] = w_in
    W_IN[d_cont_raw:, d_cont_la:] = np.eye(d_positional, dtype=f64)

    # all-label K|V projection with the input projection folded in
    W_KV = np.zeros((d_in, d_kv), f64)
    for l in range(d_l):
        W_KV[:, l * d_k:(l + 1) * d_k] = wk[l]
        W_KV[:, d_l * d_k + l * d_v:d_l * d_k + (l + 1) * d_v] = wv[l]
    WKV_F = W_IN @ W_KV                                     # [d_model, d_kv]

    # per-slot query stack with 1/temper and the softmax-weight expansion folded in.
    # Slot j serves global batch index b with b % d_l == j % d_l (B_blk % d_l == 0); the
    # torch tile/repeat quirk pairs (label l, batch b) with query (l*mb + b) % d_l.
    # K columns (0 .. d_l*d_k-1) stay exactly zero (their softmax output is garbage that
    # the exactly-zero K rows of WPR_C annihilate).
    QE = np.zeros((B_blk, d_kv, d_kv), f64)
    for j in range(B_blk):
        for l in range(d_l):
            q = wq[(l * mb + j) % d_l] / temper
            QE[j, l * d_k:(l + 1) * d_k,
               d_l * d_k + l * d_v:d_l * d_k + (l + 1) * d_v] = q[:, None]

    # per-label LayerNorm matrices; the centering matrix is folded into WPR / WXR below
    chunk = np.arange(ff_dim) // d_proj
    blk = (chunk[:, None] == chunk[None, :]).astype(f64)
    LN_C = np.eye(ff_dim, dtype=f64) - blk / d_proj
    LN_V = blk / (d_proj - 1)

    # combine_v + reduce_proj folded:  (ctx @ wp + x) @ wr  ==  ctx @ (wp@wr)  +  x @ wr
    wpr = wp @ wr                                           # [d_v, d_proj]
    WPR = np.zeros((d_kv, ff_dim), f64)
    for l in range(d_l):
        WPR[d_l * d_k + l * d_v:d_l * d_k + (l + 1) * d_v,
            l * d_proj:(l + 1) * d_proj] = wpr
    WPR_C = WPR @ LN_C                                      # K rows stay exactly zero
    WXR_C = W_IN @ np.tile(wr, (1, d_l)) @ LN_C             # [d_model, ff_dim]

    # block-diagonal partitioned feed-forward
    d_cff = ff_dim - d_positional
    w1c = np.asarray(params['w1c'], f64); w1p = np.asarray(params['w1p'], f64)
    w2c = np.asarray(params['w2c'], f64); w2p = np.asarray(params['w2p'], f64)
    dh = w1c.shape[1]
    d_hid = 2 * dh
    W1 = np.zeros((ff_dim, d_hid), f64); W1[:d_cff, :dh] = w1c; W1[d_cff:, dh:] = w1p
    W2 = np.zeros((d_hid, ff_dim), f64); W2[:dh, :d_cff] = w2c; W2[dh:, d_cff:] = w2p
    B1 = np.concatenate([np.asarray(params['b1c'], f64),
                         np.asarray(params['b1p'], f64)], axis=1)          # [1, d_hid]
    B2 = np.concatenate([np.asarray(params['b2c'], f64),
                         np.asarray(params['b2p'], f64)], axis=1)          # [1, ff_dim]

    # one lane-aligned 64-column slab (sublane-aligned row offsets) for the constants
    off_xr = 0
    off_pr = off_xr + _ru8(d_model)
    off_lnv = off_pr + _ru8(d_kv)
    off_w2 = off_lnv + _ru8(ff_dim)
    rows = off_w2 + _ru8(d_hid)
    SLAB = np.zeros((rows, ff_dim), f64)
    SLAB[off_xr:off_xr + d_model] = WXR_C
    SLAB[off_pr:off_pr + d_kv] = WPR_C
    SLAB[off_lnv:off_lnv + ff_dim] = LN_V
    SLAB[off_w2:off_w2 + d_hid] = W2

    consts = dict(
        WKV_F=jnp.asarray(WKV_F, compute_dtype),
        QE=jnp.asarray(QE, compute_dtype),
        SLAB=jnp.asarray(SLAB, compute_dtype),
        W1=jnp.asarray(W1, compute_dtype),
        B1=jnp.asarray(B1, jnp.float32),
        B2=jnp.asarray(B2, jnp.float32),
    )
    offs = dict(off_xr=off_xr, off_pr=off_pr, off_lnv=off_lnv, off_w2=off_w2, d_hid=d_hid)
    return consts, offs


# --------------------------------------------------------------------------- wrapper
def label_attention_module(word_embeddings, params, *, d_l, d_k, d_v, d_proj, d_positional,
                           block_batch=None, compute_dtype=jnp.bfloat16):
    mb = len(word_embeddings)
    lengths = [int(s.shape[0]) for s in word_embeddings]
    d_model = int(word_embeddings[0].shape[1])
    ff_dim = d_l * d_proj
    d_kv = d_l * (d_k + d_v)

    T_pad = max(8, _ru8(max(lengths)))
    # sentences per grid step: multiple of d_l (constant per-slot query stack across grid
    # steps) and of 8 (BlockSpec sublane rule when the batch axis spans several steps).
    base = int(np.lcm(8, d_l))
    B_blk = base if block_batch is None else int(block_batch)
    assert B_blk % base == 0, "block_batch must be a multiple of lcm(8, d_l)"
    # keep the per-step working set v7x-friendly (64 MiB VMEM, 32 MiB scoped default)
    while B_blk > base and B_blk * T_pad * (6 * d_kv + 6 * ff_dim) * 4 > 24 * 2**20:
        B_blk -= base
    mb_pad = ((mb + B_blk - 1) // B_blk) * B_blk

    # pack + pad (host-side glue that mirrors the BatchIndices bookkeeping)
    x_np = np.zeros((mb_pad, T_pad, d_model), np.float32)
    mask_np = np.full((mb_pad, T_pad, 1), -1e30, np.float32)
    for b, s in enumerate(word_embeddings):
        x_np[b, :lengths[b]] = np.asarray(s, np.float32)
        mask_np[b, :lengths[b]] = 0.0
    x_pad = jnp.asarray(x_np, compute_dtype)
    mask = jnp.asarray(mask_np)

    consts, offs = build_fused_weights(params, mb=mb, B_blk=B_blk, d_model=d_model,
                                       d_positional=d_positional, d_l=d_l, d_k=d_k,
                                       d_v=d_v, d_proj=d_proj, compute_dtype=compute_dtype)

    def const_spec(a):
        nd = int(a.ndim)
        return pl.BlockSpec(tuple(a.shape), lambda blk, nd=nd: (0,) * nd)

    grid_spec = pltpu.PrefetchScalarGridSpec(
        num_scalar_prefetch=0,
        grid=(mb_pad // B_blk,),
        in_specs=[
            pl.BlockSpec((B_blk, T_pad, d_model), lambda blk: (blk, 0, 0)),   # x
            pl.BlockSpec((B_blk, T_pad, 1), lambda blk: (blk, 0, 0)),         # additive mask
            const_spec(consts['QE']),
            const_spec(consts['WKV_F']),
            const_spec(consts['SLAB']),
            const_spec(consts['W1']),
            const_spec(consts['B1']),
            const_spec(consts['B2']),
        ],
        out_specs=pl.BlockSpec((B_blk, T_pad, ff_dim), lambda blk: (blk, 0, 0)),
    )

    kernel = functools.partial(
        fused_lattn_kernel, B_blk=B_blk, T_pad=T_pad, d_model=d_model, d_kv=d_kv,
        ff_dim=ff_dim, d_hid=offs['d_hid'], off_xr=offs['off_xr'], off_pr=offs['off_pr'],
        off_lnv=offs['off_lnv'], off_w2=offs['off_w2'])

    out = pl.pallas_call(
        kernel,
        out_shape=jax.ShapeDtypeStruct((mb_pad, T_pad, ff_dim), jnp.float32),
        grid_spec=grid_spec,
        compiler_params=pltpu.CompilerParams(dimension_semantics=("parallel",)),
    )(x_pad, mask, consts['QE'], consts['WKV_F'], consts['SLAB'],
      consts['W1'], consts['B1'], consts['B2'])

    # unpack back into per-sentence representations (host-side glue)
    return [out[b, :lengths[b], :] for b in range(mb)]


# --------------------------------------------------------------------------- params
def init_params(key, *, d_model, d_input_proj, d_positional, d_k, d_v, d_l, d_proj, d_ff):
    d_in = d_input_proj
    d_cont_raw = d_model - d_positional
    d_cont_la = d_in - d_positional
    ff_dim = d_l * d_proj
    d_cont_ff = ff_dim - d_positional
    ks = jax.random.split(key, 20)

    def xav(k, shape, fan_in, fan_out):
        std = float(np.sqrt(2.0 / (fan_in + fan_out)))
        return (std * jax.random.normal(k, shape)).astype(jnp.float32)

    wq1 = xav(ks[1], (d_l, d_k // 2), d_l, d_k // 2)
    wq2 = xav(ks[2], (d_l, d_k // 2), d_l, d_k // 2)
    wk1 = xav(ks[3], (d_l, d_cont_la, d_k // 2), d_cont_la, d_k // 2)
    wk2 = xav(ks[4], (d_l, d_positional, d_k // 2), d_positional, d_k // 2)
    wv1 = xav(ks[5], (d_l, d_cont_la, d_v // 2), d_cont_la, d_v // 2)
    wv2 = xav(ks[6], (d_l, d_positional, d_v // 2), d_positional, d_v // 2)
    wk_full = (jnp.zeros((d_l, d_in, d_k), jnp.float32)
               .at[:, :d_cont_la, :d_k // 2].set(wk1)
               .at[:, d_cont_la:, d_k // 2:].set(wk2))
    wv_full = (jnp.zeros((d_l, d_in, d_v), jnp.float32)
               .at[:, :d_cont_la, :d_v // 2].set(wv1)
               .at[:, d_cont_la:, d_v // 2:].set(wv2))
    proj1_t = xav(ks[7], (d_v // 2, d_cont_la), d_v // 2, d_cont_la)
    proj2_t = xav(ks[8], (d_v // 2, d_positional), d_v // 2, d_positional)
    wp_full = (jnp.zeros((d_v, d_in), jnp.float32)
               .at[:d_v // 2, :d_cont_la].set(proj1_t)
               .at[d_v // 2:, d_cont_la:].set(proj2_t))

    params = {
        'w_in': xav(ks[0], (d_cont_raw, d_cont_la), d_cont_raw, d_cont_la),
        'wq_full': jnp.concatenate([wq1, wq2], axis=-1),
        'wk_full': wk_full,
        'wv_full': wv_full,
        'wp_full': wp_full,
        'wr': xav(ks[9], (d_in, d_proj), d_in, d_proj),
        'w1c': xav(ks[10], (d_cont_ff, d_ff // 2), d_cont_ff, d_ff // 2),
        'b1c': 0.05 * jax.random.normal(ks[11], (1, d_ff // 2)).astype(jnp.float32),
        'w2c': xav(ks[12], (d_ff // 2, d_cont_ff), d_ff // 2, d_cont_ff),
        'b2c': 0.05 * jax.random.normal(ks[13], (1, d_cont_ff)).astype(jnp.float32),
        'w1p': xav(ks[14], (d_positional, d_ff // 2), d_positional, d_ff // 2),
        'b1p': 0.05 * jax.random.normal(ks[15], (1, d_ff // 2)).astype(jnp.float32),
        'w2p': xav(ks[16], (d_ff // 2, d_positional), d_ff // 2, d_positional),
        'b2p': 0.05 * jax.random.normal(ks[17], (1, d_positional)).astype(jnp.float32),
    }
    return params


# --------------------------------------------------------------------------- numpy reference
def _layernorm_np(z, eps=1e-3):
    n = z.shape[-1]
    mu = z.mean(-1, keepdims=True)
    zc = z - mu
    sigma = np.sqrt((zc * zc).sum(-1, keepdims=True) / (n - 1))
    return zc / (sigma + eps)


def reference_numpy(sentences, p, lengths, *, d_l, d_k, d_v, d_proj, d_pos):
    """Direct numpy transcription of the PyTorch forward (eval mode)."""
    inp_raw = np.concatenate(sentences, 0).astype(np.float32)
    d_model = inp_raw.shape[1]
    dc_raw = d_model - d_pos
    inp = np.concatenate([inp_raw[:, :dc_raw] @ p['w_in'], inp_raw[:, dc_raw:]], 1)
    L, d_in = inp.shape
    mb, T = len(lengths), max(lengths)
    bnd = np.cumsum([0] + list(lengths))

    k_s = np.einsum('ld,hdk->hlk', inp, p['wk_full'])
    v_s = np.einsum('ld,hdv->hlv', inp, p['wv_full'])
    q_s = p['wq_full']

    k_pad = np.zeros((d_l, mb, T, d_k), np.float32)
    v_pad = np.zeros((d_l, mb, T, d_v), np.float32)
    invalid = np.ones((mb, T), bool)
    for b in range(mb):
        s, e = bnd[b], bnd[b + 1]
        k_pad[:, b, :e - s] = k_s[:, s:e]
        v_pad[:, b, :e - s] = v_s[:, s:e]
        invalid[b, :e - s] = False
    k_pad = k_pad.reshape(d_l * mb, T, d_k)
    v_pad = v_pad.reshape(d_l * mb, T, d_v)
    q_pad = np.tile(q_s[:, None, :], (mb, 1, 1))
    attn_mask = np.tile(invalid[:, None, :], (d_l, 1, 1))

    attn = np.matmul(q_pad, k_pad.transpose(0, 2, 1)) / np.sqrt(d_in)
    attn = np.where(attn_mask, -np.inf, attn)
    attn = attn - attn.max(-1, keepdims=True)
    attn = np.exp(attn)
    attn = attn / attn.sum(-1, keepdims=True)
    out_pad = np.matmul(attn, v_pad)
    out_pad = np.tile(out_pad, (1, T, 1))
    outputs = out_pad[np.tile(~invalid, (d_l, 1))].reshape(d_l, L, d_v)

    o1 = outputs[:, :, :d_v // 2].transpose(1, 0, 2)
    o2 = outputs[:, :, d_v // 2:].transpose(1, 0, 2)
    proj1_t = p['wp_full'][:d_v // 2, :d_in - d_pos]
    proj2_t = p['wp_full'][d_v // 2:, d_in - d_pos:]
    out = np.concatenate([o1 @ proj1_t, o2 @ proj2_t], -1)
    out = out + inp[:, None, :]
    out = out @ p['wr']
    out = _layernorm_np(out).reshape(L, d_l * d_proj)

    dcff = d_l * d_proj - d_pos
    xc, xp = out[:, :dcff], out[:, dcff:]
    oc = np.maximum(xc @ p['w1c'] + p['b1c'], 0) @ p['w2c'] + p['b2c']
    op = np.maximum(xp @ p['w1p'] + p['b1p'], 0) @ p['w2p'] + p['b2p']
    z = _layernorm_np(np.concatenate([oc, op], -1) + out)
    return [z[bnd[b]:bnd[b + 1]] for b in range(mb)]


# --------------------------------------------------------------------------- main
if __name__ == "__main__":
    d_model, d_input_proj, d_positional = 40, 32, 8
    d_k = d_v = 16
    d_l, d_proj, d_ff = 4, 16, 64
    lengths = [5, 8]

    key = jax.random.PRNGKey(0)
    pkey, k0, k1 = jax.random.split(key, 3)
    params = init_params(pkey, d_model=d_model, d_input_proj=d_input_proj,
                         d_positional=d_positional, d_k=d_k, d_v=d_v,
                         d_l=d_l, d_proj=d_proj, d_ff=d_ff)
    sentences = [jax.random.normal(k0, (lengths[0], d_model), jnp.float32),
                 jax.random.normal(k1, (lengths[1], d_model), jnp.float32)]

    p_np = {k: np.asarray(v) for k, v in params.items()}
    refs = reference_numpy([np.asarray(s) for s in sentences], p_np, lengths,
                           d_l=d_l, d_k=d_k, d_v=d_v, d_proj=d_proj, d_pos=d_positional)

    run = functools.partial(label_attention_module, params=params, d_l=d_l, d_k=d_k,
                            d_v=d_v, d_proj=d_proj, d_positional=d_positional)

    # f32 MXU operands: verifies the host-side weight-folding algebra (the only remaining
    # approximation is the EUP approximate reciprocal in the softmax / LayerNorms).
    outs32 = [jax.block_until_ready(o) for o in run(sentences, compute_dtype=jnp.float32)]
    for o, r in zip(outs32, refs):
        assert o.shape == r.shape, (o.shape, r.shape)
        err = float(np.max(np.abs(np.asarray(o, np.float32) - r)))
        assert err < 5e-2, f"f32 path mismatch vs reference: max abs err {err}"

    # bf16 MXU operands (the perf configuration for the v5e/v6e/v7x MXU); accumulation and
    # all softmax / LayerNorm arithmetic stay f32, so error is at the bf16-rounding level.
    outs16 = [jax.block_until_ready(o) for o in run(sentences, compute_dtype=jnp.bfloat16)]
    for o, r in zip(outs16, refs):
        a = np.asarray(o, np.float32)
        assert np.all(np.isfinite(a))
        err = float(np.max(np.abs(a - r)))
        assert err < 1.5e-1, f"bf16 path mismatch vs reference: max abs err {err}"

    # TODO(synk): dropout layers (FeatureDropout / attention / relu dropout) are stochastic
    # training-time ops; this kernel implements the deterministic eval-mode path, and the
    # LayerNorm affine params are taken at their init values (identity).
    print("KERNEL_OK")
</pallas_src>

<mosaic_0001>
module attributes {stable_mosaic.version = 11 : i64} {
  func.func @fused_lattn_kernel(%arg0: i32, %arg1: memref<8x8x40xf32, #tpu.memory_space<vmem>>, %arg2: memref<8x8x1xf32, #tpu.memory_space<vmem>>, %arg3: memref<8x128x128xf32, #tpu.memory_space<vmem>>, %arg4: memref<40x128xf32, #tpu.memory_space<vmem>>, %arg5: memref<296x64xf32, #tpu.memory_space<vmem>>, %arg6: memref<64x64xf32, #tpu.memory_space<vmem>>, %arg7: memref<1x64xf32, #tpu.memory_space<vmem>>, %arg8: memref<1x64xf32, #tpu.memory_space<vmem>>, %arg9: memref<8x8x64xf32, #tpu.memory_space<vmem>>) attributes {dimension_semantics = [#tpu.dimension_semantics<parallel>], iteration_bounds = array<i64: 1>, scalar_prefetch = 0 : i64, scratch_operands = 0 : i64, tpu.core_type = #tpu.core_type<tc>, window_params = [{transform_indices = @transform_0, window_bounds = array<i64: 8, 8, 40>}, {transform_indices = @transform_1, window_bounds = array<i64: 8, 8, 1>}, {pipeline_mode = #tpu.pipeline_mode<synchronous>, transform_indices = @transform_2, window_bounds = array<i64: 8, 128, 128>}, {pipeline_mode = #tpu.pipeline_mode<synchronous>, transform_indices = @transform_3, window_bounds = array<i64: 40, 128>}, {pipeline_mode = #tpu.pipeline_mode<synchronous>, transform_indices = @transform_4, window_bounds = array<i64: 296, 64>}, {pipeline_mode = #tpu.pipeline_mode<synchronous>, transform_indices = @transform_5, window_bounds = array<i64: 64, 64>}, {pipeline_mode = #tpu.pipeline_mode<synchronous>, transform_indices = @transform_6, window_bounds = array<i64: 1, 64>}, {pipeline_mode = #tpu.pipeline_mode<synchronous>, transform_indices = @transform_7, window_bounds = array<i64: 1, 64>}, {transform_indices = @transform_8, window_bounds = array<i64: 8, 8, 64>}]} {
    %c0 = arith.constant 0 : index
    %c0_0 = arith.constant 0 : index
    %c0_1 = arith.constant 0 : index
    %0 = vector.load %arg1[%c0, %c0_0, %c0_1] : memref<8x8x40xf32, #tpu.memory_space<vmem>>, vector<8x8x40xf32>
    %1 = vector.shape_cast %0 : vector<8x8x40xf32> to vector<64x40xf32>
    %c0_2 = arith.constant 0 : index
    %c0_3 = arith.constant 0 : index
    %2 = vector.load %arg4[%c0_2, %c0_3] : memref<40x128xf32, #tpu.memory_space<vmem>>, vector<40x128xf32>
    %cst = arith.constant dense<0.000000e+00> : vector<64x128xf32>
    %3 = tpu.matmul %1, %2, %cst {dimension_numbers = #tpu.dot_dimension_numbers<[1], [0], [0], [1], [0, 0, 1, 1], [], []>} : vector<64x40xf32>, vector<40x128xf32>, vector<64x128xf32> -> vector<64x128xf32>
    %c0_4 = arith.constant 0 : index
    %c0_5 = arith.constant 0 : index
    %4 = vector.load %arg5[%c0_4, %c0_5] : memref<296x64xf32, #tpu.memory_space<vmem>>, vector<40x64xf32>
    %cst_6 = arith.constant dense<0.000000e+00> : vector<64x64xf32>
    %5 = tpu.matmul %1, %4, %cst_6 {dimension_numbers = #tpu.dot_dimension_numbers<[1], [0], [0], [1], [0, 0, 1, 1], [], []>} : vector<64x40xf32>, vector<40x64xf32>, vector<64x64xf32> -> vector<64x64xf32>
    %6 = vector.shape_cast %3 : vector<64x128xf32> to vector<8x8x128xf32>
    %c0_7 = arith.constant 0 : index
    %c0_8 = arith.constant 0 : index
    %c0_9 = arith.constant 0 : index
    %7 = vector.load %arg3[%c0_7, %c0_8, %c0_9] : memref<8x128x128xf32, #tpu.memory_space<vmem>>, vector<8x128x128xf32>
    "tpu.trace_start"() <{level = 10 : i32, message = "btk,bkd->btd"}> : () -> ()
    %cst_10 = arith.constant dense<0.000000e+00> : vector<8x8x128xf32>
    %8 = tpu.matmul %6, %7, %cst_10 {dimension_numbers = #tpu.dot_dimension_numbers<[2], [1], [1], [2], [0, 0, 0, 1, 1, 2], [0], [0]>} : vector<8x8x128xf32>, vector<8x128x128xf32>, vector<8x8x128xf32> -> vector<8x8x128xf32>
    "tpu.trace_stop"() : () -> ()
    %c0_11 = arith.constant 0 : index
    %c0_12 = arith.constant 0 : index
    %c0_13 = arith.constant 0 : index
    %9 = vector.load %arg2[%c0_11, %c0_12, %c0_13] : memref<8x8x1xf32, #tpu.memory_space<vmem>>, vector<8x8x1xf32>
    %10 = vector.broadcast %9 : vector<8x8x1xf32> to vector<8x8x128xf32>
    %11 = arith.addf %8, %10 : vector<8x8x128xf32>
    %cst_14 = arith.constant dense<0xFF800000> : vector<8x128xf32>
    %12 = vector.multi_reduction <maximumf>, %11, %cst_14 [1] : vector<8x8x128xf32> to vector<8x128xf32>
    %13 = vector.shape_cast %12 : vector<8x128xf32> to vector<8x1x128xf32>
    %14 = vector.broadcast %13 : vector<8x1x128xf32> to vector<8x8x128xf32>
    %15 = arith.subf %11, %14 : vector<8x8x128xf32>
    %16 = math.exp %15 : vector<8x8x128xf32>
    %cst_15 = arith.constant dense<0.000000e+00> : vector<8x128xf32>
    %17 = vector.multi_reduction <add>, %16, %cst_15 [1] : vector<8x8x128xf32> to vector<8x128xf32>
    %18 = vector.shape_cast %17 : vector<8x128xf32> to vector<8x1x128xf32>
    %19 = arith.mulf %16, %6 : vector<8x8x128xf32>
    %cst_16 = arith.constant dense<0.000000e+00> : vector<8x128xf32>
    %20 = vector.multi_reduction <add>, %19, %cst_16 [1] : vector<8x8x128xf32> to vector<8x128xf32>
    %21 = vector.shape_cast %20 : vector<8x128xf32> to vector<8x1x128xf32>
    %cst_17 = arith.constant 1.000000e-30 : f32
    %22 = vector.broadcast %cst_17 : f32 to vector<8x1x128xf32>
    %23 = arith.maximumf %18, %22 : vector<8x1x128xf32>
    %24 = tpu.reciprocal %23 {approx = true} : vector<8x1x128xf32> -> vector<8x1x128xf32>
    %25 = arith.mulf %21, %24 : vector<8x1x128xf32>
    %26 = vector.shape_cast %25 : vector<8x1x128xf32> to vector<8x1x128xf32>
    %27 = vector.broadcast %26 : vector<8x1x128xf32> to vector<8x8x128xf32>
    %28 = vector.shape_cast %27 : vector<8x8x128xf32> to vector<64x128xf32>
    %c40 = arith.constant 40 : index
    %c0_18 = arith.constant 0 : index
    %29 = vector.load %arg5[%c40, %c0_18] : memref<296x64xf32, #tpu.memory_space<vmem>>, vector<128x64xf32>
    %cst_19 = arith.constant dense<0.000000e+00> : vector<64x64xf32>
    %30 = tpu.matmul %28, %29, %cst_19 {dimension_numbers = #tpu.dot_dimension_numbers<[1], [0], [0], [1], [0, 0, 1, 1], [], []>} : vector<64x128xf32>, vector<128x64xf32>, vector<64x64xf32> -> vector<64x64xf32>
    %31 = arith.addf %30, %5 : vector<64x64xf32>
    %c168 = arith.constant 168 : index
    %c0_20 = arith.constant 0 : index
    %32 = vector.load %arg5[%c168, %c0_20] : memref<296x64xf32, #tpu.memory_space<vmem>>, vector<64x64xf32>
    %33 = arith.mulf %31, %31 : vector<64x64xf32>
    %cst_21 = arith.constant dense<0.000000e+00> : vector<64x64xf32>
    %34 = tpu.matmul %33, %32, %cst_21 {dimension_numbers = #tpu.dot_dimension_numbers<[1], [0], [0], [1], [0, 0, 1, 1], [], []>} : vector<64x64xf32>, vector<64x64xf32>, vector<64x64xf32> -> vector<64x64xf32>
    %35 = math.sqrt %34 : vector<64x64xf32>
    %cst_22 = arith.constant 1.000000e-03 : f32
    %36 = vector.broadcast %cst_22 : f32 to vector<64x64xf32>
    %37 = arith.addf %35, %36 : vector<64x64xf32>
    %38 = tpu.reciprocal %37 {approx = true} : vector<64x64xf32> -> vector<64x64xf32>
    %39 = arith.mulf %31, %38 : vector<64x64xf32>
    %c232 = arith.constant 232 : index
    %c0_23 = arith.constant 0 : index
    %40 = vector.load %arg5[%c232, %c0_23] : memref<296x64xf32, #tpu.memory_space<vmem>>, vector<64x64xf32>
    %c0_24 = arith.constant 0 : index
    %c0_25 = arith.constant 0 : index
    %41 = vector.load %arg6[%c0_24, %c0_25] : memref<64x64xf32, #tpu.memory_space<vmem>>, vector<64x64xf32>
    %cst_26 = arith.constant dense<0.000000e+00> : vector<64x64xf32>
    %42 = tpu.matmul %39, %41, %cst_26 {dimension_numbers = #tpu.dot_dimension_numbers<[1], [0], [0], [1], [0, 0, 1, 1], [], []>} : vector<64x64xf32>, vector<64x64xf32>, vector<64x64xf32> -> vector<64x64xf32>
    %c0_27 = arith.constant 0 : index
    %c0_28 = arith.constant 0 : index
    %43 = vector.load %arg7[%c0_27, %c0_28] : memref<1x64xf32, #tpu.memory_space<vmem>>, vector<1x64xf32>
    %44 = vector.broadcast %43 : vector<1x64xf32> to vector<64x64xf32>
    %45 = arith.addf %42, %44 : vector<64x64xf32>
    %cst_29 = arith.constant 0.000000e+00 : f32
    %46 = vector.broadcast %cst_29 : f32 to vector<64x64xf32>
    %47 = arith.maximumf %45, %46 : vector<64x64xf32>
    %cst_30 = arith.constant dense<0.000000e+00> : vector<64x64xf32>
    %48 = tpu.matmul %47, %40, %cst_30 {dimension_numbers = #tpu.dot_dimension_numbers<[1], [0], [0], [1], [0, 0, 1, 1], [], []>} : vector<64x64xf32>, vector<64x64xf32>, vector<64x64xf32> -> vector<64x64xf32>
    %c0_31 = arith.constant 0 : index
    %c0_32 = arith.constant 0 : index
    %49 = vector.load %arg8[%c0_31, %c0_32] : memref<1x64xf32, #tpu.memory_space<vmem>>, vector<1x64xf32>
    %50 = vector.broadcast %49 : vector<1x64xf32> to vector<64x64xf32>
    %51 = arith.addf %48, %50 : vector<64x64xf32>
    %52 = arith.addf %51, %39 : vector<64x64xf32>
    %cst_33 = arith.constant dense<0.000000e+00> : vector<64xf32>
    %53 = vector.multi_reduction <add>, %52, %cst_33 [1] : vector<64x64xf32> to vector<64xf32>
    %54 = vector.shape_cast %53 : vector<64xf32> to vector<64x1xf32>
    %cst_34 = arith.constant 6.400000e+01 : f32
    %55 = vector.broadcast %cst_34 : f32 to vector<64x1xf32>
    %56 = arith.divf %54, %55 : vector<64x1xf32>
    %57 = vector.broadcast %56 : vector<64x1xf32> to vector<64x64xf32>
    %58 = arith.subf %52, %57 : vector<64x64xf32>
    %59 = arith.mulf %58, %58 : vector<64x64xf32>
    %cst_35 = arith.constant dense<0.000000e+00> : vector<64xf32>
    %60 = vector.multi_reduction <add>, %59, %cst_35 [1] : vector<64x64xf32> to vector<64xf32>
    %61 = vector.shape_cast %60 : vector<64xf32> to vector<64x1xf32>
    %cst_36 = arith.constant 6.300000e+01 : f32
    %62 = vector.broadcast %cst_36 : f32 to vector<64x1xf32>
    %63 = arith.divf %61, %62 : vector<64x1xf32>
    %64 = math.sqrt %63 : vector<64x1xf32>
    %cst_37 = arith.constant 1.000000e-03 : f32
    %65 = vector.broadcast %cst_37 : f32 to vector<64x1xf32>
    %66 = arith.addf %64, %65 : vector<64x1xf32>
    %67 = tpu.reciprocal %66 {approx = true} : vector<64x1xf32> -> vector<64x1xf32>
    %68 = vector.broadcast %67 : vector<64x1xf32> to vector<64x64xf32>
    %69 = arith.mulf %58, %68 : vector<64x64xf32>
    %70 = vector.shape_cast %69 : vector<64x64xf32> to vector<8x8x64xf32>
    %c0_38 = arith.constant 0 : index
    %c0_39 = arith.constant 0 : index
    %c0_40 = arith.constant 0 : index
    %71 = vector.load %arg9[%c0_38, %c0_39, %c0_40] : memref<8x8x64xf32, #tpu.memory_space<vmem>>, vector<8x8x64xf32>
    tpu.vector_store %arg9[%c0_38, %c0_39, %c0_40], %70 {strides = array<i32>} : memref<8x8x64xf32, #tpu.memory_space<vmem>>, vector<8x8x64xf32>,
    return
  }
  func.func @transform_0(%arg0: i32) -> (i32, i32, i32) {
    %c0_i32 = arith.constant 0 : i32
    %c0_i32_0 = arith.constant 0 : i32
    %c0_i32_1 = arith.constant 0 : i32
    return %arg0, %c0_i32, %c0_i32_0 : i32, i32, i32
  }
  func.func @transform_1(%arg0: i32) -> (i32, i32, i32) {
    %c0_i32 = arith.constant 0 : i32
    %c0_i32_0 = arith.constant 0 : i32
    %c0_i32_1 = arith.constant 0 : i32
    return %arg0, %c0_i32, %c0_i32_0 : i32, i32, i32
  }
  func.func @transform_2(%arg0: i32) -> (i32, i32, i32) {
    %c0_i32 = arith.constant 0 : i32
    %c0_i32_0 = arith.constant 0 : i32
    %c0_i32_1 = arith.constant 0 : i32
    %c0_i32_2 = arith.constant 0 : i32
    return %c0_i32, %c0_i32_0, %c0_i32_1 : i32, i32, i32
  }
  func.func @transform_3(%arg0: i32) -> (i32, i32) {
    %c0_i32 = arith.constant 0 : i32
    %c0_i32_0 = arith.constant 0 : i32
    %c0_i32_1 = arith.constant 0 : i32
    return %c0_i32, %c0_i32_0 : i32, i32
  }
  func.func @transform_4(%arg0: i32) -> (i32, i32) {
    %c0_i32 = arith.constant 0 : i32
    %c0_i32_0 = arith.constant 0 : i32
    %c0_i32_1 = arith.constant 0 : i32
    return %c0_i32, %c0_i32_0 : i32, i32
  }
  func.func @transform_5(%arg0: i32) -> (i32, i32) {
    %c0_i32 = arith.constant 0 : i32
    %c0_i32_0 = arith.constant 0 : i32
    %c0_i32_1 = arith.constant 0 : i32
    return %c0_i32, %c0_i32_0 : i32, i32
  }
  func.func @transform_6(%arg0: i32) -> (i32, i32) {
    %c0_i32 = arith.constant 0 : i32
    %c0_i32_0 = arith.constant 0 : i32
    %c0_i32_1 = arith.constant 0 : i32
    return %c0_i32, %c0_i32_0 : i32, i32
  }
  func.func @transform_7(%arg0: i32) -> (i32, i32) {
    %c0_i32 = arith.constant 0 : i32
    %c0_i32_0 = arith.constant 0 : i32
    %c0_i32_1 = arith.constant 0 : i32
    return %c0_i32, %c0_i32_0 : i32, i32
  }
  func.func @transform_8(%arg0: i32) -> (i32, i32, i32) {
    %c0_i32 = arith.constant 0 : i32
    %c0_i32_0 = arith.constant 0 : i32
    %c0_i32_1 = arith.constant 0 : i32
    return %arg0, %c0_i32, %c0_i32_0 : i32, i32, i32
  }
}

</mosaic_0001>

<bundles_post_ra>
// kernel: tpu_custom_call.1
= control target key start
LH: loop header
LB: loop body
LE: loop exit
PB: predicated region body
PF: predicated region fallthrough
CT: control target
= control target key end

     0   :  { %13 = vsyncpa [#allocation3], 0  ;;  %s3832_s0 = inlined_call_operand.vmem [shape: f32[8,8,40], index: 0, kind: input, shape index: {}]   ;;  %s3833_s1 = inlined_call_operand.vmem [shape: f32[8,8,1], index: 1, kind: input, shape index: {}]   ;;  %s3834_s2 = inlined_call_operand.hbm [shape: f32[8,128,128], index: 2, kind: input, shape index: {}]   ;;  %s3835_s3 = inlined_call_operand.vmem [shape: f32[40,128], index: 3, kind: input, shape index: {}]   ;;  %s3836_s4 = inlined_call_operand.vmem [shape: f32[296,64], index: 4, kind: input, shape index: {}]   ;;  %s3837_s5 = inlined_call_operand.vmem [shape: f32[64,64], index: 5, kind: input, shape index: {}]   ;;  %s3838_s6 = inlined_call_operand.vmem [shape: f32[1,64], index: 6, kind: input, shape index: {}]   ;;  %s3839_s7 = inlined_call_operand.vmem [shape: f32[1,64], index: 7, kind: input, shape index: {}]   ;;  %s3840_s8 = inlined_call_operand.hbm [shape: f32[8,8,64], index: 8, kind: output, shape index: {}]  }
   0x1   :  { %14 = vsyncpa [#allocation4], 0  ;;  %s3257_s27 = smov [#allocation2]   ;;  %s3209_s9 = scalar_lea.hbm %s3834_s2, 16384 }
   0x2   :  { %s24_s28 = sshll.u32 %s3257_s27, 4  ;;  %p3210_p0 = scmp.ne.s32.totalorder %s3834_s2, %s3209_s9  ;;  %s25_s28 = int_to_ptr.vmem [resolvable:$true] %s24_s28 }
   0x3   :  { %p3213_p1 = scmp.lt.u32.totalorder %s3209_s9, %s3834_s2 }
   0x5   :  { %p3215_p2 = pnand %p3213_p1, %p3210_p0 }
   0x7   :  { %3218 = shalt.err (!%p3215_p2)
}
   0x8   :  { %s3219_s14 = scalar_lea.vmem %s25_s28, 16384  ;;  %p3224_p4 = scmp.lt.s32.totalorder %s25_s28, %s25_s28 }
   0x9   :  { %p3220_p3 = scmp.ne.s32.totalorder %s25_s28, %s3219_s14  ;;  %p3225_p5 = scmp.lt.s32.totalorder %s3219_s14, %s3219_s14 }
   0xb   :  { %p3226_p6 = por %p3225_p5, %p3224_p4 }
   0xd   :  { %p3227_p7 = pnand %p3226_p6, %p3220_p3 }
   0xf   :  { %3230 = shalt.err (!%p3227_p7)
}
  0x10   :  { %s3258_s15 = smov 128   ;;  %s3259_s16 = smov 8  }
  0x11   :  { %30 = dma.hbm_to_vmem [thread:$0]  %s3834_s2, 16384, %s25_s28, [#allocation3], %s3258_s15, %s3258_s15, %s3259_s16  }
  0x12   :  { %3253 = dma.done.wait [#allocation3], 16384  }
  0x13   :  { %3254 = vsyncadd [#allocation3], 4294950912  ;;  %vm57_vm0 = vcmask 326656   ;;  %v52_v0 = vld [vmem:[%s3835_s3] sm:$0xff]  ;;  %v53_v1 = vld [vmem:[%s3835_s3 + $0x8] sm:$0xff]  ;;  %v3260_v25 = vmov 0.0|0.0  }
  0x14   :  { %v54_v2 = vld [vmem:[%s3835_s3 + $0x10] sm:$0xff]  ;;  %v2799_v3 = vpack.c.bf16 %v53_v1, %v52_v0  ;;  %v55_v4 = vld [vmem:[%s3835_s3 + $0x18] sm:$0xff]  ;;  %v44_v5 = vld [vmem:[%s3832_s0] sm:$0xff]  ;;  %vm3261_vm1 = vmmov 0   ;;  %vm1370_vm2 = vcmask 523264  }
  0x15   :  { %v2803_v6 = vpack.c.bf16 %v55_v4, %v54_v2  ;;  %2357 = vmatprep.mubr.msk.f32.mxu0 %vm57_vm0, %v44_v5  ;;  %2379 = vmatprep.mubr.msk.f32.mxu1 %vm57_vm0, %v44_v5  ;;  %v187_v7 = vld [vmem:[%s3836_s4] sm:$0xff]  ;;  %v188_v8 = vld [vmem:[%s3836_s4 + $0x8] sm:$0xff]  ;;  %v189_v10 = vld [vmem:[%s3836_s4 + $0x10] sm:$0xff] }
  0x16   :  { %2800 = vmatprep.subr.bf16.mxu0 %v2799_v3  ;;  %v2807_v9 = vpack.c.bf16 %v188_v8, %v187_v7  ;;  %v190_v11 = vld [vmem:[%s3836_s4 + $0x18] sm:$0xff]  ;;  %v56_v12 = vld [vmem:[%s3835_s3 + $0x20] sm:$0xff]  ;;  %v298_v15 = vld [vmem:[#allocation2 + $0x8] sm:$0xff]  ;;  %v3262_v7 = vmov 0.0  }
  0x17   :  { %2802 = vmatpush3.bf16.msra.mxu0 %v2799_v3  ;;  %v2811_v13 = vpack.c.bf16 %v190_v11, %v189_v10  ;;  %v297_v14 = vld [vmem:[#allocation2] sm:$0xff]  ;;  %v45_v16 = vld [vmem:[%s3832_s0 + $0x8] sm:$0xff]  ;;  %v46_v18 = vld [vmem:[%s3832_s0 + $0x10] sm:$0xff] }
  0x18   :  { %2804 = vmatprep.subr.bf16.mxu0 %v2803_v6  ;;  %2808 = vmatprep.subr.bf16.mxu1 %v2807_v9  ;;  %v191_v17 = vld [vmem:[%s3836_s4 + $0x20] sm:$0xff]  ;;  %v2816_v20 = vpack.c.bf16 %v298_v15, %v297_v14  ;;  %v314_v21 = vld [vmem:[#allocation2 + $0x88] sm:$0xff]  ;;  %v299_v22 = vld [vmem:[#allocation2 + $0x10] sm:$0xff] }
  0x19   :  { %2810 = vmatpush3.bf16.msra.mxu1 %v2807_v9  ;;  %v313_v19 = vld [vmem:[#allocation2 + $0x80] sm:$0xff]  ;;  %v300_v23 = vld [vmem:[#allocation2 + $0x18] sm:$0xff]  ;;  %v315_v28 = vld [vmem:[#allocation2 + $0x90] sm:$0xff]  ;;  %v3263_v9 = vmov 0  }
  0x1a   :  { %2812 = vmatprep.subr.bf16.mxu1 %v2811_v13  ;;  %v47_v24 = vld [vmem:[%s3832_s0 + $0x18] sm:$0xff]  ;;  %v48_v26 = vld [vmem:[%s3832_s0 + $0x20] sm:$0xff]  ;;  %v2840_v27 = vpack.c.bf16 %v314_v21, %v313_v19  ;;  %v2819_v29 = vpack.c.bf16 %v300_v23, %v299_v22  ;;  %v302_v32 = vld [vmem:[#allocation2 + $0x28] sm:$0xff]  ;;  %3111 = vset.pattern.permute.xlu0 %v3263_v9 }
  0x1b   :  { %2806 = vmatpush3.bf16.msra.mxu0 %v2803_v6  ;;  %v316_v30 = vld [vmem:[#allocation2 + $0x98] sm:$0xff]  ;;  %v301_v31 = vld [vmem:[#allocation2 + $0x20] sm:$0xff]  ;;  %v49_v33 = vld [vmem:[%s3832_s0 + $0x28] sm:$0xff]  ;;  %3112 = vset.pattern.permute.xlu1 %v3263_v9 }
  0x1c   :  { %2355 = vmatprep.subr.mxu0 %v56_v12  ;;  %v50_v34 = vld [vmem:[%s3832_s0 + $0x30] sm:$0xff]  ;;  %v2843_v35 = vpack.c.bf16 %v316_v30, %v315_v28  ;;  %v317_v36 = vld [vmem:[#allocation2 + $0xa0] sm:$0xff]  ;;  %v2822_v37 = vpack.c.bf16 %v302_v32, %v301_v31  ;;  %v318_v38 = vld [vmem:[#allocation2 + $0xa8] sm:$0xff] }
  0x1d   :  { %2814 = vmatpush3.bf16.msra.mxu1 %v2811_v13  ;;  %v303_v39 = vld [vmem:[#allocation2 + $0x30] sm:$0xff]  ;;  %v304_v40 = vld [vmem:[#allocation2 + $0x38] sm:$0xff]  ;;  %v2846_v42 = vpack.c.bf16 %v318_v38, %v317_v36  ;;  %v305_v46 = vld [vmem:[#allocation2 + $0x40] sm:$0xff] }
  0x1e   :  { %2377 = vmatprep.subr.mxu1 %v191_v17  ;;  %v51_v41 = vld [vmem:[%s3832_s0 + $0x38] sm:$0xff]  ;;  %v319_v43 = vld [vmem:[#allocation2 + $0xb0] sm:$0xff]  ;;  %v2825_v44 = vpack.c.bf16 %v304_v40, %v303_v39  ;;  %v306_v47 = vld [vmem:[#allocation2 + $0x48] sm:$0xff] }
  0x1f   :  { %2356 = vmatpush3.msra.mxu0 %v56_v12  ;;  %v320_v45 = vld [vmem:[#allocation2 + $0xb8] sm:$0xff]  ;;  %v321_v49 = vld [vmem:[#allocation2 + $0xc0] sm:$0xff]  ;;  %v2828_v50 = vpack.c.bf16 %v306_v47, %v305_v46  ;;  %v322_v51 = vld [vmem:[#allocation2 + $0xc8] sm:$0xff] }
  0x20   :  { %2358 = vmatmul.mubr.msk.f32.vlgmr.msra.gmra.mrb[0].mxu0 %vm57_vm0, %v45_v16  ;;  %2815 = vmatprep.subr.bf16.mxu0 %v3260_v25  ;;  %v2849_v48 = vpack.c.bf16 %v320_v45, %v319_v43  ;;  %v307_v52 = vld [vmem:[#allocation2 + $0x50] sm:$0xff]  ;;  %v308_v53 = vld [vmem:[#allocation2 + $0x58] sm:$0xff]  ;;  %v2852_v54 = vpack.c.bf16 %v322_v51, %v321_v49  ;;  %v309_v58 = vld [vmem:[#allocation2 + $0x60] sm:$0xff] }
  0x21   :  { %2360 = vmatprep.mubr.msk.f32.mxu0 %vm57_vm0, %v46_v18  ;;  %2817 = vmatpush3.bf16.msra.mxu0 %v2816_v20  ;;  %v323_v55 = vld [vmem:[#allocation2 + $0xd0] sm:$0xff]  ;;  %v2831_v56 = vpack.c.bf16 %v308_v53, %v307_v52  ;;  %v324_v57 = vld [vmem:[#allocation2 + $0xd8] sm:$0xff]  ;;  %v310_v59 = vld [vmem:[#allocation2 + $0x68] sm:$0xff] }
  0x22   :  { %2378 = vmatpush3.msra.mxu1 %v191_v17  ;;  %2818 = vmatprep.subr.bf16.mxu0 %v3260_v25  ;;  %v2855_v60 = vpack.c.bf16 %v324_v57, %v323_v55  ;;  %v325_v61 = vld [vmem:[#allocation2 + $0xe0] sm:$0xff]  ;;  %v2834_v62 = vpack.c.bf16 %v310_v59, %v309_v58  ;;  %v326_v63 = vld [vmem:[#allocation2 + $0xe8] sm:$0xff]  ;;  %v311_v0 = vld [vmem:[#allocation2 + $0x70] sm:$0xff] }
  0x23   :  { %2839 = vmatprep.subr.bf16.mxu1 %v3260_v25  ;;  %2380 = vmatmul.mubr.msk.f32.vlgmr.msra.gmra.mrb[0].mxu1 %vm57_vm0, %v45_v16  ;;  %v312_v1 = vld [vmem:[#allocation2 + $0x78] sm:$0xff]  ;;  %v2858_v2 = vpack.c.bf16 %v326_v63, %v325_v61  ;;  %v327_v4 = vld [vmem:[#allocation2 + $0xf0] sm:$0xff]  ;;  %v425_v8 = vld [vmem:[%s3833_s1] sm:$0xff] }
  0x24   :  { %2361 = vmatmul.mubr.msk.f32.gmra.mrb[2].mxu0 %vm57_vm0, %v47_v24  ;;  %2841 = vmatpush3.bf16.msra.mxu1 %v2840_v27  ;;  %v2837_v3 = vpack.c.bf16 %v312_v1, %v311_v0  ;;  %v328_v5 = vld [vmem:[#allocation2 + $0xf8] sm:$0xff]  ;;  %v426_v10 = vld [vmem:[%s3833_s1 + $0x8] sm:$0xff]  ;;  %v427_v11 = vld [vmem:[%s3833_s1 + $0x10] sm:$0xff] }
  0x25   :  { %2363 = vmatprep.mubr.msk.f32.mxu0 %vm57_vm0, %v48_v26  ;;  %2820 = vmatpush3.bf16.msra.mxu0 %v2819_v29  ;;  %v2861_v6 = vpack.c.bf16 %v328_v5, %v327_v4  ;;  %v429_v12 = vld [vmem:[%s3833_s1 + $0x20] sm:$0xff]  ;;  %v428_v13 = vld [vmem:[%s3833_s1 + $0x18] sm:$0xff]  ;;  %v431_v14 = vld [vmem:[%s3833_s1 + $0x30] sm:$0xff] }
  0x26   :  { %2842 = vmatprep.subr.bf16.mxu1 %v3260_v25  ;;  %2821 = vmatprep.subr.bf16.mxu0 %v3260_v25  ;;  %v430_v15 = vld [vmem:[%s3833_s1 + $0x28] sm:$0xff]  ;;  %v432_v16 = vld [vmem:[%s3833_s1 + $0x38] sm:$0xff]  ;;  %v345_v17 = vld [vmem:[#allocation2 + $0x180] sm:$0xff] }
  0x27   :  { %2382 = vmatprep.mubr.msk.f32.mxu1 %vm57_vm0, %v46_v18  ;;  %435 = vperm.xlu0 %3111, %v425_v8   ;;  %v346_v18 = vld [vmem:[#allocation2 + $0x188] sm:$0xff]  ;;  %v329_v19 = vld [vmem:[#allocation2 + $0x100] sm:$0xff]  ;;  %v347_v23 = vld [vmem:[#allocation2 + $0x190] sm:$0xff] }
  0x28   :  { %2364 = vmatmul.mubr.msk.f32.gmra.mrb[4].mxu0 %vm57_vm0, %v49_v33  ;;  %2383 = vmatmul.mubr.msk.f32.gmra.mrb[2].mxu1 %vm57_vm0, %v47_v24  ;;  %v330_v20 = vld [vmem:[#allocation2 + $0x108] sm:$0xff]  ;;  %v2888_v21 = vpack.c.bf16 %v346_v18, %v345_v17  ;;  %v348_v24 = vld [vmem:[#allocation2 + $0x198] sm:$0xff]  ;;  %v331_v27 = vld [vmem:[#allocation2 + $0x110] sm:$0xff] }
  0x29   :  { %2366 = vmatprep.mubr.msk.f32.mxu0 %vm57_vm0, %v50_v34  ;;  %2844 = vmatpush3.bf16.msra.mxu1 %v2843_v35  ;;  %v2864_v22 = vpack.c.bf16 %v330_v20, %v329_v19  ;;  %v332_v28 = vld [vmem:[#allocation2 + $0x118] sm:$0xff]  ;;  %v2891_v30 = vpack.c.bf16 %v348_v24, %v347_v23  ;;  %v349_v32 = vld [vmem:[#allocation2 + $0x1a0] sm:$0xff]  ;;  %v334_v35 = vld [vmem:[#allocation2 + $0x128] sm:$0xff] }
  0x2a   :  { %2823 = vmatpush3.bf16.msra.mxu0 %v2822_v37  ;;  %2845 = vmatprep.subr.bf16.mxu1 %v3260_v25  ;;  %v2867_v31 = vpack.c.bf16 %v332_v28, %v331_v27  ;;  %v351_v40 = vld [vmem:[#allocation2 + $0x1b0] sm:$0xff]  ;;  %v336_v43 = vld [vmem:[#allocation2 + $0x138] sm:$0xff]  ;;  %v354_v49 = vld [vmem:[#allocation2 + $0x1c8] sm:$0xff] }
  0x2b   :  { %2824 = vmatprep.subr.bf16.mxu0 %v3260_v25  ;;  %2385 = vmatprep.mubr.msk.f32.mxu1 %vm57_vm0, %v48_v26  ;;  %v338_v51 = vld [vmem:[#allocation2 + $0x148] sm:$0xff]  ;;  %v356_v57 = vld [vmem:[#allocation2 + $0x1d8] sm:$0xff]  ;;  %v339_v58 = vld [vmem:[#allocation2 + $0x150] sm:$0xff] }
  0x2c   :  { %2367 = vmatmul.mubr.msk.f32.gmra.mrb[6].mxu0 %vm57_vm0, %v51_v41  ;;  %2386 = vmatmul.mubr.msk.f32.gmra.mrb[4].mxu1 %vm57_vm0, %v49_v33  ;;  %v350_v33 = vld [vmem:[#allocation2 + $0x1a8] sm:$0xff]  ;;  %v340_v59 = vld [vmem:[#allocation2 + $0x158] sm:$0xff]  ;;  %v341_v0 = vld [vmem:[#allocation2 + $0x160] sm:$0xff] }
  0x2d   :  { %2847 = vmatpush3.bf16.msra.mxu1 %v2846_v42  ;;  %2388 = vmatprep.mubr.msk.f32.mxu1 %vm57_vm0, %v50_v34  ;;  %v333_v34 = vld [vmem:[#allocation2 + $0x120] sm:$0xff]  ;;  %v2894_v38 = vpack.c.bf16 %v350_v33, %v349_v32  ;;  %v335_v42 = vld [vmem:[#allocation2 + $0x130] sm:$0xff]  ;;  %v2879_v61 = vpack.c.bf16 %v340_v59, %v339_v58  ;;  %v358_v63 = vld [vmem:[#allocation2 + $0x1e8] sm:$0xff] }
  0x2e   :  { %2826 = vmatpush3.bf16.msra.mxu0 %v2825_v44  ;;  %2848 = vmatprep.subr.bf16.mxu1 %v3260_v25  ;;  %v2870_v39 = vpack.c.bf16 %v334_v35, %v333_v34  ;;  %v2873_v47 = vpack.c.bf16 %v336_v43, %v335_v42  ;;  %v342_v1 = vld [vmem:[#allocation2 + $0x168] sm:$0xff]  ;;  %v359_v4 = vld [vmem:[#allocation2 + $0x1f0] sm:$0xff]  ;;  %v360_v5 = vld [vmem:[#allocation2 + $0x1f8] sm:$0xff] }
  0x2f   :  { %2827 = vmatprep.subr.bf16.mxu0 %v3260_v25  ;;  %2423 = vmatprep.mubr.msk.f32.mxu0 %vm3261_vm1, %v3262_v7  ;;  %v344_v8 = vld [vmem:[#allocation2 + $0x178] sm:$0xff]  ;;  %v2909_v9 = vpack.c.bf16 %v360_v5, %v359_v4  ;;  %v379_v17 = vld [vmem:[#allocation2 + $0x290] sm:$0xff]  ;;  %v381_v23 = vld [vmem:[#allocation2 + $0x2a0] sm:$0xff] }
  0x30   :  { %2389 = vmatmul.mubr.msk.f32.gmra.mrb[6].mxu1 %vm57_vm0, %v51_v41  ;;  %440 = vperm.xlu0 %3111, %v426_v10   ;;  %v352_v41 = vld [vmem:[#allocation2 + $0x1b8] sm:$0xff]  ;;  %v363_v19 = vld [vmem:[#allocation2 + $0x210] sm:$0xff]  ;;  %v382_v24 = vld [vmem:[#allocation2 + $0x2a8] sm:$0xff] }
  0x31   :  { %2850 = vmatpush3.bf16.msra.mxu1 %v2849_v48  ;;  %2458 = vmatprep.mubr.msk.f32.mxu1 %vm3261_vm1, %v3262_v7  ;;  %v2897_v46 = vpack.c.bf16 %v352_v41, %v351_v40  ;;  %v353_v48 = vld [vmem:[#allocation2 + $0x1c0] sm:$0xff]  ;;  %v380_v18 = vld [vmem:[#allocation2 + $0x298] sm:$0xff]  ;;  %v366_v28 = vld [vmem:[#allocation2 + $0x228] sm:$0xff] }
  0x32   :  { %2829 = vmatpush3.bf16.msra.mxu0 %v2828_v50  ;;  %2851 = vmatprep.subr.bf16.mxu1 %v3260_v25  ;;  %v337_v50 = vld [vmem:[#allocation2 + $0x140] sm:$0xff]  ;;  %v364_v20 = vld [vmem:[#allocation2 + $0x218] sm:$0xff]  ;;  %v383_v32 = vld [vmem:[#allocation2 + $0x2b0] sm:$0xff] }
  0x33   :  { %2830 = vmatprep.subr.bf16.mxu0 %v3260_v25  ;;  %445 = vperm.xlu1 %3112, %v427_v11   ;;  %v2876_v55 = vpack.c.bf16 %v338_v51, %v337_v50  ;;  %v377_v11 = vld [vmem:[#allocation2 + $0x280] sm:$0xff]  ;;  %v384_v33 = vld [vmem:[#allocation2 + $0x2b8] sm:$0xff]  ;;  %v367_v34 = vld [vmem:[#allocation2 + $0x230] sm:$0xff] }
  0x34   :  { %455 = vperm.xlu0 %3111, %v429_v12   ;;  %v378_v12 = vld [vmem:[#allocation2 + $0x288] sm:$0xff]  ;;  %v365_v27 = vld [vmem:[#allocation2 + $0x220] sm:$0xff]  ;;  %v368_v35 = vld [vmem:[#allocation2 + $0x238] sm:$0xff] }
  0x35   :  { %2853 = vmatpush3.bf16.msra.mxu1 %v2852_v54  ;;  %v2900_v54 = vpack.c.bf16 %v354_v49, %v353_v48  ;;  %v385_v40 = vld [vmem:[#allocation2 + $0x2c0] sm:$0xff]  ;;  %v386_v41 = vld [vmem:[#allocation2 + $0x2c8] sm:$0xff]  ;;  %v387_v48 = vld [vmem:[#allocation2 + $0x2d0] sm:$0xff] }
  0x36   :  { %2832 = vmatpush3.bf16.msra.mxu0 %v2831_v56  ;;  %2854 = vmatprep.subr.bf16.mxu1 %v3260_v25  ;;  %v355_v56 = vld [vmem:[#allocation2 + $0x1d0] sm:$0xff]  ;;  %v369_v42 = vld [vmem:[#allocation2 + $0x240] sm:$0xff]  ;;  %v370_v43 = vld [vmem:[#allocation2 + $0x248] sm:$0xff] }
  0x37   :  { %2833 = vmatprep.subr.bf16.mxu0 %v3260_v25  ;;  %450 = vperm.xlu1 %3112, %v428_v13   ;;  %v361_v13 = vld [vmem:[#allocation2 + $0x200] sm:$0xff]  ;;  %v388_v49 = vld [vmem:[#allocation2 + $0x2d8] sm:$0xff]  ;;  %v371_v50 = vld [vmem:[#allocation2 + $0x250] sm:$0xff] }
  0x38   :  { %465 = vperm.xlu0 %3111, %v431_v14   ;;  %v362_v14 = vld [vmem:[#allocation2 + $0x208] sm:$0xff]  ;;  %v372_v51 = vld [vmem:[#allocation2 + $0x258] sm:$0xff]  ;;  %v373_v58 = vld [vmem:[#allocation2 + $0x260] sm:$0xff] }
  0x39   :  { %2856 = vmatpush3.bf16.msra.mxu1 %v2855_v60  ;;  %v2903_v60 = vpack.c.bf16 %v356_v57, %v355_v56  ;;  %v389_v56 = vld [vmem:[#allocation2 + $0x2e0] sm:$0xff]  ;;  %v390_v57 = vld [vmem:[#allocation2 + $0x2e8] sm:$0xff] }
  0x3a   :  { %2835 = vmatpush3.bf16.msra.mxu0 %v2834_v62  ;;  %2857 = vmatprep.subr.bf16.mxu1 %v3260_v25  ;;  %v357_v62 = vld [vmem:[#allocation2 + $0x1e0] sm:$0xff]  ;;  %v374_v59 = vld [vmem:[#allocation2 + $0x268] sm:$0xff] }
  0x3b   :  { %2836 = vmatprep.subr.bf16.mxu0 %v3260_v25  ;;  %460 = vperm.xlu1 %3112, %v430_v15   ;;  %v2936_v15 = vpack.c.bf16 %v378_v12, %v377_v11  ;;  %v409_v4 = vld [vmem:[#allocation2 + $0x380] sm:$0xff]  ;;  %v410_v5 = vld [vmem:[#allocation2 + $0x388] sm:$0xff]  ;;  %v411_v11 = vld [vmem:[#allocation2 + $0x390] sm:$0xff] }
  0x3c   :  { %v412_v12 = vld [vmem:[#allocation2 + $0x398] sm:$0xff] }
  0x3d   :  { %2859 = vmatpush3.bf16.msra.mxu1 %v2858_v2  ;;  %v2906_v2 = vpack.c.bf16 %v358_v63, %v357_v62  ;;  %v391_v62 = vld [vmem:[#allocation2 + $0x2f0] sm:$0xff]  ;;  %v392_v63 = vld [vmem:[#allocation2 + $0x2f8] sm:$0xff] }
  0x3e   :  { %2838 = vmatpush3.bf16.msra.mxu0 %v2837_v3  ;;  %2860 = vmatprep.subr.bf16.mxu1 %v3260_v25  ;;  %v2882_v3 = vpack.c.bf16 %v342_v1, %v341_v0  ;;  %v375_v0 = vld [vmem:[#allocation2 + $0x270] sm:$0xff]  ;;  %v376_v1 = vld [vmem:[#allocation2 + $0x278] sm:$0xff] }
  0x3f   :  { %2863 = vmatprep.subr.bf16.mxu0 %v3260_v25  ;;  %470 = vperm.xlu1 %3112, %v432_v16   ;;  %v2912_v16 = vpack.c.bf16 %v362_v14, %v361_v13  ;;  %v395_v13 = vld [vmem:[#allocation2 + $0x310] sm:$0xff]  ;;  %v396_v14 = vld [vmem:[#allocation2 + $0x318] sm:$0xff] }
  0x41   :  { %2862 = vmatpush3.bf16.msra.mxu1 %v2861_v6  ;;  %v343_v6 = vld [vmem:[#allocation2 + $0x170] sm:$0xff] }
  0x42   :  { %2887 = vmatprep.subr.bf16.mxu1 %v3260_v25  ;;  %v2885_v10 = vpack.c.bf16 %v344_v8, %v343_v6  ;;  %v393_v6 = vld [vmem:[#allocation2 + $0x300] sm:$0xff]  ;;  %v394_v8 = vld [vmem:[#allocation2 + $0x308] sm:$0xff] }
  0xf3   :  { %v3441_v26 = vpop.f32.mrb[0].mxu0 }
  0xf4   :  { %v3443_v29 = vpop.f32.mrb[1].mxu0  ;;  %2459 = vmatmul.mubr.f32.vlgmr.msra.gmra.mrb[8].mxu1 %v3441_v26 }
  0xf5   :  { %2889 = vmatpush3.bf16.msra.mxu1 %v2888_v21  ;;  %2424 = vmatmul.mubr.f32.vlgmr.msra.gmra.mrb[8].mxu0 %v3443_v29  ;;  %v2939_v21 = vpack.c.bf16 %v380_v18, %v379_v17  ;;  %v413_v17 = vld [vmem:[#allocation2 + $0x3a0] sm:$0xff]  ;;  %v414_v18 = vld [vmem:[#allocation2 + $0x3a8] sm:$0xff] }
  0xf6   :  { %2865 = vmatpush3.bf16.msra.mxu0 %v2864_v22  ;;  %2890 = vmatprep.subr.bf16.mxu1 %v3260_v25  ;;  %v2915_v22 = vpack.c.bf16 %v364_v20, %v363_v19  ;;  %v397_v19 = vld [vmem:[#allocation2 + $0x320] sm:$0xff]  ;;  %v398_v20 = vld [vmem:[#allocation2 + $0x328] sm:$0xff] }
  0xf7   :  { %2866 = vmatprep.subr.bf16.mxu0 %v3260_v25  ;;  %v3449_v36 = vpop.f32.mrb[2].mxu0  ;;  %2528 = vmatprep.mubr.msk.f32.mxu1 %vm3261_vm1, %v3262_v7 }
  0xf8   :  { %v3453_v37 = vpop.f32.mrb[3].mxu0  ;;  %2493 = vmatprep.mubr.msk.f32.mxu0 %vm3261_vm1, %v3262_v7 }
  0xf9   :  { %2892 = vmatpush3.bf16.msra.mxu1 %v2891_v30  ;;  %v2942_v30 = vpack.c.bf16 %v382_v24, %v381_v23  ;;  %v415_v23 = vld [vmem:[#allocation2 + $0x3b0] sm:$0xff]  ;;  %v416_v24 = vld [vmem:[#allocation2 + $0x3b8] sm:$0xff] }
  0xfa   :  { %2868 = vmatpush3.bf16.msra.mxu0 %v2867_v31  ;;  %2893 = vmatprep.subr.bf16.mxu1 %v3260_v25  ;;  %v2918_v31 = vpack.c.bf16 %v366_v28, %v365_v27  ;;  %v399_v27 = vld [vmem:[#allocation2 + $0x330] sm:$0xff]  ;;  %v400_v28 = vld [vmem:[#allocation2 + $0x338] sm:$0xff] }
  0xfb   :  { %2869 = vmatprep.subr.bf16.mxu0 %v3260_v25  ;;  %v3459_v44 = vpop.f32.mrb[4].mxu0 }
  0xfc   :  { %v3461_v45 = vpop.f32.mrb[5].mxu0 }
  0xfd   :  { %2895 = vmatpush3.bf16.msra.mxu1 %v2894_v38  ;;  %v2945_v38 = vpack.c.bf16 %v384_v33, %v383_v32  ;;  %v417_v32 = vld [vmem:[#allocation2 + $0x3c0] sm:$0xff] }
  0xfe   :  { %2871 = vmatpush3.bf16.msra.mxu0 %v2870_v39  ;;  %2896 = vmatprep.subr.bf16.mxu1 %v3260_v25  ;;  %v2921_v39 = vpack.c.bf16 %v368_v35, %v367_v34  ;;  %v401_v33 = vld [vmem:[#allocation2 + $0x340] sm:$0xff]  ;;  %v402_v34 = vld [vmem:[#allocation2 + $0x348] sm:$0xff] }
  0xff   :  { %2872 = vmatprep.subr.bf16.mxu0 %v3260_v25  ;;  %v3465_v52 = vpop.f32.mrb[6].mxu0 }
 0x100   :  { %v3467_v53 = vpop.f32.mrb[7].mxu0 }
 0x101   :  { %2898 = vmatpush3.bf16.msra.mxu1 %v2897_v46  ;;  %v2948_v46 = vpack.c.bf16 %v386_v41, %v385_v40  ;;  %v420_v40 = vld [vmem:[#allocation2 + $0x3d8] sm:$0xff]  ;;  %v403_v41 = vld [vmem:[#allocation2 + $0x350] sm:$0xff] }
 0x102   :  { %2874 = vmatpush3.bf16.msra.mxu0 %v2873_v47  ;;  %2899 = vmatprep.subr.bf16.mxu1 %v3260_v25  ;;  %v2924_v47 = vpack.c.bf16 %v370_v43, %v369_v42  ;;  %v404_v42 = vld [vmem:[#allocation2 + $0x358] sm:$0xff] }
 0x103   :  { %2875 = vmatprep.subr.bf16.mxu0 %v3260_v25 }
 0x105   :  { %2901 = vmatpush3.bf16.msra.mxu1 %v2900_v54  ;;  %v2951_v54 = vpack.c.bf16 %v388_v49, %v387_v48  ;;  %v422_v48 = vld [vmem:[#allocation2 + $0x3e8] sm:$0xff]  ;;  %v405_v49 = vld [vmem:[#allocation2 + $0x360] sm:$0xff] }
 0x106   :  { %2877 = vmatpush3.bf16.msra.mxu0 %v2876_v55  ;;  %2902 = vmatprep.subr.bf16.mxu1 %v3260_v25  ;;  %v2927_v55 = vpack.c.bf16 %v372_v51, %v371_v50  ;;  %v406_v50 = vld [vmem:[#allocation2 + $0x368] sm:$0xff] }
 0x107   :  { %2878 = vmatprep.subr.bf16.mxu0 %v3260_v25 }
 0x109   :  { %2904 = vmatpush3.bf16.msra.mxu1 %v2903_v60  ;;  %v2954_v60 = vpack.c.bf16 %v390_v57, %v389_v56  ;;  %v424_v56 = vld [vmem:[#allocation2 + $0x3f8] sm:$0xff]  ;;  %v407_v57 = vld [vmem:[#allocation2 + $0x370] sm:$0xff] }
 0x10a   :  { %2880 = vmatpush3.bf16.msra.mxu0 %v2879_v61  ;;  %2905 = vmatprep.subr.bf16.mxu1 %v3260_v25  ;;  %v2930_v61 = vpack.c.bf16 %v374_v59, %v373_v58  ;;  %v408_v58 = vld [vmem:[#allocation2 + $0x378] sm:$0xff] }
 0x10b   :  { %2881 = vmatprep.subr.bf16.mxu0 %v3260_v25 }
 0x10d   :  { %2907 = vmatpush3.bf16.msra.mxu1 %v2906_v2  ;;  %v2957_v2 = vpack.c.bf16 %v392_v63, %v391_v62  ;;  %v1234_v62 = vld [vmem:[%s3836_s4 + $0x30] sm:$0xff] }
 0x10e   :  { %2883 = vmatpush3.bf16.msra.mxu0 %v2882_v3  ;;  %2908 = vmatprep.subr.bf16.mxu1 %v3260_v25  ;;  %v2933_v3 = vpack.c.bf16 %v376_v1, %v375_v0  ;;  %v1236_v0 = vld [vmem:[%s3836_s4 + $0x40] sm:$0xff] }
 0x10f   :  { %2884 = vmatprep.subr.bf16.mxu0 %v3260_v25 }
 0x111   :  { %2910 = vmatpush3.bf16.msra.mxu1 %v2909_v9  ;;  %v2984_v9 = vpack.c.bf16 %v410_v5, %v409_v4  ;;  %v1239_v5 = vld [vmem:[%s3836_s4 + $0x58] sm:$0xff] }
 0x112   :  { %2886 = vmatpush3.bf16.msra.mxu0 %v2885_v10  ;;  %2935 = vmatprep.subr.bf16.mxu1 %v3260_v25  ;;  %v2960_v10 = vpack.c.bf16 %v394_v8, %v393_v6  ;;  %v1240_v6 = vld [vmem:[%s3836_s4 + $0x60] sm:$0xff] }
 0x113   :  { %2911 = vmatprep.subr.bf16.mxu0 %v3260_v25  ;;  %v3019_v8 = vpack.c.bf16 %v1240_v6, %v1239_v5 }
 0x114   :  { %2529 = vmatmul.mubr.f32.vlgmr.msra.gmra.mrb[10].mxu1 %v3449_v36 }
 0x115   :  { %2494 = vmatmul.mubr.f32.vlgmr.msra.gmra.mrb[10].mxu0 %v3453_v37  ;;  %2937 = vmatpush3.bf16.msra.mxu1 %v2936_v15  ;;  %v2987_v15 = vpack.c.bf16 %v412_v12, %v411_v11  ;;  %v1243_v12 = vld [vmem:[%s3836_s4 + $0x78] sm:$0xff] }
 0x116   :  { %2913 = vmatpush3.bf16.msra.mxu0 %v2912_v16  ;;  %2938 = vmatprep.subr.bf16.mxu1 %v3260_v25  ;;  %v2963_v16 = vpack.c.bf16 %v396_v14, %v395_v13  ;;  %v1244_v13 = vld [vmem:[%s3836_s4 + $0x80] sm:$0xff] }
 0x117   :  { %2914 = vmatprep.subr.bf16.mxu0 %v3260_v25  ;;  %2598 = vmatprep.mubr.msk.f32.mxu1 %vm3261_vm1, %v3262_v7  ;;  %v3027_v14 = vpack.c.bf16 %v1244_v13, %v1243_v12 }
 0x118   :  { %2563 = vmatprep.mubr.msk.f32.mxu0 %vm3261_vm1, %v3262_v7 }
 0x119   :  { %2940 = vmatpush3.bf16.msra.mxu1 %v2939_v21  ;;  %v2990_v21 = vpack.c.bf16 %v414_v18, %v413_v17  ;;  %v1247_v18 = vld [vmem:[%s3836_s4 + $0x98] sm:$0xff] }
 0x11a   :  { %2916 = vmatpush3.bf16.msra.mxu0 %v2915_v22  ;;  %2941 = vmatprep.subr.bf16.mxu1 %v3260_v25  ;;  %v2966_v22 = vpack.c.bf16 %v398_v20, %v397_v19  ;;  %v1248_v19 = vld [vmem:[%s3836_s4 + $0xa0] sm:$0xff] }
 0x11b   :  { %2917 = vmatprep.subr.bf16.mxu0 %v3260_v25  ;;  %v3035_v20 = vpack.c.bf16 %v1248_v19, %v1247_v18 }
 0x11d   :  { %2943 = vmatpush3.bf16.msra.mxu1 %v2942_v30  ;;  %v2993_v30 = vpack.c.bf16 %v416_v24, %v415_v23 }
 0x11e   :  { %2919 = vmatpush3.bf16.msra.mxu0 %v2918_v31  ;;  %2944 = vmatprep.subr.bf16.mxu1 %v3260_v25  ;;  %v2969_v31 = vpack.c.bf16 %v400_v28, %v399_v27 }
 0x11f   :  { %2920 = vmatprep.subr.bf16.mxu0 %v3260_v25 }
 0x121   :  { %2946 = vmatpush3.bf16.msra.mxu1 %v2945_v38  ;;  %v2972_v38 = vpack.c.bf16 %v402_v34, %v401_v33 }
 0x122   :  { %2922 = vmatpush3.bf16.msra.mxu0 %v2921_v39  ;;  %2947 = vmatprep.subr.bf16.mxu1 %v3260_v25  ;;  %v419_v39 = vld [vmem:[#allocation2 + $0x3d0] sm:$0xff] }
 0x123   :  { %2923 = vmatprep.subr.bf16.mxu0 %v3260_v25  ;;  %v2999_v43 = vpack.c.bf16 %v420_v40, %v419_v39 }
 0x125   :  { %2949 = vmatpush3.bf16.msra.mxu1 %v2948_v46  ;;  %v2975_v46 = vpack.c.bf16 %v404_v42, %v403_v41 }
 0x126   :  { %2925 = vmatpush3.bf16.msra.mxu0 %v2924_v47  ;;  %2950 = vmatprep.subr.bf16.mxu1 %v3260_v25  ;;  %v421_v47 = vld [vmem:[#allocation2 + $0x3e0] sm:$0xff] }
 0x127   :  { %2926 = vmatprep.subr.bf16.mxu0 %v3260_v25  ;;  %v3002_v51 = vpack.c.bf16 %v422_v48, %v421_v47 }
 0x129   :  { %2952 = vmatpush3.bf16.msra.mxu1 %v2951_v54  ;;  %v2978_v54 = vpack.c.bf16 %v406_v50, %v405_v49 }
 0x12a   :  { %2928 = vmatpush3.bf16.msra.mxu0 %v2927_v55  ;;  %2953 = vmatprep.subr.bf16.mxu1 %v3260_v25  ;;  %v423_v55 = vld [vmem:[#allocation2 + $0x3f0] sm:$0xff] }
 0x12b   :  { %2929 = vmatprep.subr.bf16.mxu0 %v3260_v25  ;;  %v3005_v59 = vpack.c.bf16 %v424_v56, %v423_v55  ;;  %v1355_v55 = vld [vmem:[%s3836_s4 + $0xb0] sm:$0xff]  ;;  %v1356_v56 = vld [vmem:[%s3836_s4 + $0xb8] sm:$0xff] }
 0x12d   :  { %2955 = vmatpush3.bf16.msra.mxu1 %v2954_v60  ;;  %v2981_v60 = vpack.c.bf16 %v408_v58, %v407_v57  ;;  %v1357_v58 = vld [vmem:[%s3836_s4 + $0xc0] sm:$0xff] }
 0x12e   :  { %2931 = vmatpush3.bf16.msra.mxu0 %v2930_v61  ;;  %2956 = vmatprep.subr.bf16.mxu1 %v3260_v25  ;;  %v1233_v61 = vld [vmem:[%s3836_s4 + $0x28] sm:$0xff] }
 0x12f   :  { %2932 = vmatprep.subr.bf16.mxu0 %v3260_v25  ;;  %v3007_v63 = vpack.c.bf16 %v1234_v62, %v1233_v61  ;;  %v1358_v61 = vld [vmem:[%s3836_s4 + $0xc8] sm:$0xff]  ;;  %v1359_v62 = vld [vmem:[%s3836_s4 + $0xd0] sm:$0xff] }
 0x130   :  { %v3047_v6 = vpack.c.bf16 %v1359_v62, %v1358_v61 }
 0x131   :  { %2958 = vmatpush3.bf16.msra.mxu1 %v2957_v2  ;;  %v1237_v2 = vld [vmem:[%s3836_s4 + $0x48] sm:$0xff] }
 0x132   :  { %2934 = vmatpush3.bf16.msra.mxu0 %v2933_v3  ;;  %2983 = vmatprep.subr.bf16.mxu1 %v3260_v25  ;;  %v1238_v3 = vld [vmem:[%s3836_s4 + $0x50] sm:$0xff] }
 0x133   :  { %2959 = vmatprep.subr.bf16.mxu0 %v3260_v25  ;;  %v3015_v4 = vpack.c.bf16 %v1238_v3, %v1237_v2 }
 0x134   :  { %2599 = vmatmul.mubr.f32.vlgmr.msra.gmra.mrb[12].mxu1 %v3459_v44 }
 0x135   :  { %2564 = vmatmul.mubr.f32.vlgmr.msra.gmra.mrb[12].mxu0 %v3461_v45  ;;  %2985 = vmatpush3.bf16.msra.mxu1 %v2984_v9  ;;  %v1241_v9 = vld [vmem:[%s3836_s4 + $0x68] sm:$0xff] }
 0x136   :  { %2961 = vmatpush3.bf16.msra.mxu0 %v2960_v10  ;;  %2986 = vmatprep.subr.bf16.mxu1 %v3260_v25  ;;  %v1242_v10 = vld [vmem:[%s3836_s4 + $0x70] sm:$0xff] }
 0x137   :  { %2962 = vmatprep.subr.bf16.mxu0 %v3260_v25  ;;  %2668 = vmatprep.mubr.msk.f32.mxu1 %vm3261_vm1, %v3262_v7  ;;  %v3023_v11 = vpack.c.bf16 %v1242_v10, %v1241_v9 }
 0x138   :  { %2633 = vmatprep.mubr.msk.f32.mxu0 %vm3261_vm1, %v3262_v7  ;;  %v418_v7 = vld [vmem:[#allocation2 + $0x3c8] sm:$0xff] }
 0x139   :  { %2988 = vmatpush3.bf16.msra.mxu1 %v2987_v15  ;;  %v2996_v35 = vpack.c.bf16 %v418_v7, %v417_v32  ;;  %v1245_v15 = vld [vmem:[%s3836_s4 + $0x88] sm:$0xff] }
 0x13a   :  { %2964 = vmatpush3.bf16.msra.mxu0 %v2963_v16  ;;  %2989 = vmatprep.subr.bf16.mxu1 %v3260_v25  ;;  %v1246_v16 = vld [vmem:[%s3836_s4 + $0x90] sm:$0xff] }
 0x13b   :  { %2965 = vmatprep.subr.bf16.mxu0 %v3260_v25  ;;  %v3031_v17 = vpack.c.bf16 %v1246_v16, %v1245_v15 }
 0x13d   :  { %2991 = vmatpush3.bf16.msra.mxu1 %v2990_v21  ;;  %v436_v21 = vpop.permute.xlu0 %435 }
 0x13e   :  { %2967 = vmatpush3.bf16.msra.mxu0 %v2966_v22  ;;  %2992 = vmatprep.subr.bf16.mxu1 %v3260_v25 }
 0x13f   :  { %2968 = vmatprep.subr.bf16.mxu0 %v3260_v25 }
 0x141   :  { %2994 = vmatpush3.bf16.msra.mxu1 %v2993_v30  ;;  %v441_v22 = vpop.permute.xlu0 %440 }
 0x142   :  { %2970 = vmatpush3.bf16.msra.mxu0 %v2969_v31  ;;  %2995 = vmatprep.subr.bf16.mxu1 %v3260_v25 }
 0x143   :  { %2971 = vmatprep.subr.bf16.mxu0 %v3260_v25 }
 0x145   :  { %2997 = vmatpush3.bf16.msra.mxu1 %v2996_v35 }
 0x146   :  { %2973 = vmatpush3.bf16.msra.mxu0 %v2972_v38  ;;  %2998 = vmatprep.subr.bf16.mxu1 %v3260_v25 }
 0x147   :  { %2974 = vmatprep.subr.bf16.mxu0 %v3260_v25 }
 0x149   :  { %3000 = vmatpush3.bf16.msra.mxu1 %v2999_v43 }
 0x14a   :  { %2976 = vmatpush3.bf16.msra.mxu0 %v2975_v46  ;;  %3001 = vmatprep.subr.bf16.mxu1 %v3260_v25 }
 0x14b   :  { %2977 = vmatprep.subr.bf16.mxu0 %v3260_v25 }
 0x14d   :  { %3003 = vmatpush3.bf16.msra.mxu1 %v3002_v51  ;;  %v446_v51 = vpop.permute.xlu1 %445 }
 0x14e   :  { %2979 = vmatpush3.bf16.msra.mxu0 %v2978_v54  ;;  %3004 = vmatprep.subr.bf16.mxu1 %v3260_v25  ;;  %v1354_v54 = vld [vmem:[%s3836_s4 + $0xa8] sm:$0xff] }
 0x14f   :  { %2980 = vmatprep.subr.bf16.mxu0 %v3260_v25  ;;  %v1235_v25 = vld [vmem:[%s3836_s4 + $0x38] sm:$0xff]  ;;  %v3039_v57 = vpack.c.bf16 %v1355_v55, %v1354_v54 }
 0x150   :  { %v3011_v1 = vpack.c.bf16 %v1236_v0, %v1235_v25 }
 0x151   :  { %3006 = vmatpush3.bf16.msra.mxu1 %v3005_v59  ;;  %v451_v25 = vpop.permute.xlu1 %450 }
 0x152   :  { %2982 = vmatpush3.bf16.msra.mxu0 %v2981_v60  ;;  %3008 = vmatprep.subr.bf16.mxu1 %v3007_v63  ;;  %v3043_v60 = vpack.c.bf16 %v1357_v58, %v1356_v56 }
 0x153   :  { %3040 = vmatprep.subr.bf16.mxu0 %v3039_v57 }
 0x154   :  { %2669 = vmatmul.mubr.f32.vlgmr.msra.gmra.mrb[14].mxu1 %v3465_v52 }
 0x155   :  { %2634 = vmatmul.mubr.f32.vlgmr.msra.gmra.mrb[14].mxu0 %v3467_v53  ;;  %3010 = vmatpush3.bf16.msra.mxu1 %v3007_v63 }
 0x156   :  { %3012 = vmatprep.subr.bf16.mxu1 %v3011_v1  ;;  %3042 = vmatpush3.bf16.msra.mxu0 %v3039_v57 }
 0x157   :  { %3044 = vmatprep.subr.bf16.mxu0 %v3043_v60 }
 0x159   :  { %3014 = vmatpush3.bf16.msra.mxu1 %v3011_v1 }
 0x15a   :  { %3016 = vmatprep.subr.bf16.mxu1 %v3015_v4  ;;  %3046 = vmatpush3.bf16.msra.mxu0 %v3043_v60 }
 0x15b   :  { %3048 = vmatprep.subr.bf16.mxu0 %v3047_v6 }
 0x15d   :  { %3018 = vmatpush3.bf16.msra.mxu1 %v3015_v4 }
 0x15e   :  { %3020 = vmatprep.subr.bf16.mxu1 %v3019_v8  ;;  %3050 = vmatpush3.bf16.msra.mxu0 %v3047_v6 }
 0x161   :  { %3022 = vmatpush3.bf16.msra.mxu1 %v3019_v8 }
 0x162   :  { %3024 = vmatprep.subr.bf16.mxu1 %v3023_v11 }
 0x165   :  { %3026 = vmatpush3.bf16.msra.mxu1 %v3023_v11 }
 0x166   :  { %3028 = vmatprep.subr.bf16.mxu1 %v3027_v14 }
 0x169   :  { %3030 = vmatpush3.bf16.msra.mxu1 %v3027_v14 }
 0x16a   :  { %3032 = vmatprep.subr.bf16.mxu1 %v3031_v17 }
 0x16d   :  { %3034 = vmatpush3.bf16.msra.mxu1 %v3031_v17 }
 0x16e   :  { %3036 = vmatprep.subr.bf16.mxu1 %v3035_v20 }
 0x171   :  { %3038 = vmatpush3.bf16.msra.mxu1 %v3035_v20 }
 0x1c7   :  { %v609_v23 = vpop.f32.mrb[8].mxu1 }
 0x1c8   :  { %v610_v24 = vadd.f32 %v609_v23, %v441_v22  ;;  %v539_v27 = vpop.f32.mrb[8].mxu0  ;;  %v2460_v28 = vpop.f32.mrb[9].mxu1 }
 0x1c9   :  { %v540_v30 = vadd.f32 %v539_v27, %v436_v21  ;;  %v2425_v31 = vpop.f32.mrb[9].mxu0 }
 0x1ca   :  { %v1039_v32 = vrot.slane %v610_v24, 4 }
 0x1cb   :  { %v1033_v7 = vrot.slane %v540_v30, 4 }
 0x1cc   :  { %v1040_v33 = vmax.f32 %v610_v24, %v1039_v32 }
 0x1cd   :  { %v1034_v34 = vmax.f32 %v540_v30, %v1033_v7 }
 0x1ce   :  { %v1041_v35 = vrot.slane %v1040_v33, 2 }
 0x1cf   :  { %v1035_v38 = vrot.slane %v1034_v34, 2 }
 0x1d0   :  { %v1042_v39 = vmax.f32 %v1040_v33, %v1041_v35 }
 0x1d1   :  { %v1036_v40 = vmax.f32 %v1034_v34, %v1035_v38 }
 0x1d2   :  { %v1043_v41 = vrot.slane %v1042_v39, 1 }
 0x1d3   :  { %v1037_v42 = vrot.slane %v1036_v40, 1 }
 0x1d4   :  { %v1044_v43 = vmax.f32 %v1042_v39, %v1043_v41 }
 0x1d5   :  { %v1038_v46 = vmax.f32 %v1036_v40, %v1037_v42 }
 0x1d6   :  { %v1082_v47 = vsub.f32 %v610_v24, %v1044_v43 }
 0x1d7   :  { %v1081_v48 = vsub.f32 %v540_v30, %v1038_v46 }
 0x1d8   :  { %v1091_v49 = vmul.f32 1.442695, %v1082_v47 }
 0x1d9   :  { %v1089_v50 = vmul.f32 1.442695, %v1081_v48 }
 0x1da   :  { %3113 = vpow2.f32 %v1091_v49 }
 0x1db   :  { %3115 = vpow2.f32 %v1089_v50 }
 0x1e4   :  { %v3114_v59 = vpop.eup %3113 }
 0x1e5   :  { %v3116_v63 = vpop.eup %3115  ;;  %v1111_v0 = vrot.slane %v3114_v59, 4  ;;  %v1154_v1 = vmul.f32 %v3114_v59, %v3441_v26 }
 0x1e6   :  { %v1105_v2 = vrot.slane %v3116_v63, 4  ;;  %v1153_v3 = vmul.f32 %v3116_v63, %v3443_v29 }
 0x1e7   :  { %v749_v4 = vpop.f32.mrb[10].mxu1  ;;  %v1112_v5 = vadd.f32 %v3114_v59, %v1111_v0  ;;  %v1167_v12 = vrot.slane %v1154_v1, 4 }
 0x1e8   :  { %v750_v8 = vadd.f32 %v749_v4, %v451_v25  ;;  %v679_v9 = vpop.f32.mrb[10].mxu0  ;;  %v2530_v10 = vpop.f32.mrb[11].mxu1  ;;  %v1106_v11 = vadd.f32 %v3116_v63, %v1105_v2  ;;  %v1161_v15 = vrot.slane %v1153_v3, 4 }
 0x1e9   :  { %v680_v13 = vadd.f32 %v679_v9, %v446_v51  ;;  %v2495_v14 = vpop.f32.mrb[11].mxu0  ;;  %v1113_v16 = vrot.slane %v1112_v5, 2  ;;  %v1168_v21 = vadd.f32 %v1167_v12, %v1154_v1  ;;  %v461_v25 = vpop.permute.xlu1 %460 }
 0x1ea   :  { %v1051_v17 = vrot.slane %v750_v8, 4  ;;  %v1107_v26 = vrot.slane %v1106_v11, 2  ;;  %v1162_v23 = vadd.f32 %v1161_v15, %v1153_v3  ;;  %v456_v2 = vpop.permute.xlu0 %455 }
 0x1eb   :  { %v1045_v18 = vrot.slane %v680_v13, 4  ;;  %v1114_v19 = vadd.f32 %v1113_v16, %v1112_v5  ;;  %v1169_v33 = vrot.slane %v1168_v21, 2 }
 0x1ec   :  { %v1052_v29 = vmax.f32 %v750_v8, %v1051_v17  ;;  %v1108_v20 = vadd.f32 %v1107_v26, %v1106_v11  ;;  %v1163_v35 = vrot.slane %v1162_v23, 2 }
 0x1ed   :  { %v1046_v22 = vmax.f32 %v680_v13, %v1045_v18  ;;  %v1115_v24 = vrot.slane %v1114_v19, 1  ;;  %v1170_v43 = vadd.f32 %v1169_v33, %v1168_v21 }
 0x1ee   :  { %v1053_v27 = vrot.slane %v1052_v29, 2  ;;  %v1109_v28 = vrot.slane %v1108_v20, 1  ;;  %v1164_v47 = vadd.f32 %v1163_v35, %v1162_v23 }
 0x1ef   :  { %v1047_v30 = vrot.slane %v1046_v22, 2  ;;  %v1116_v31 = vadd.f32 %v1115_v24, %v1114_v19  ;;  %v1171_v51 = vrot.slane %v1170_v43, 1 }
 0x1f0   :  { %v1054_v32 = vmax.f32 %v1052_v29, %v1053_v27  ;;  %v1110_v7 = vadd.f32 %v1109_v28, %v1108_v20  ;;  %v1165_v55 = vrot.slane %v1164_v47, 1 }
 0x1f1   :  { %v1048_v34 = vmax.f32 %v1046_v22, %v1047_v30  ;;  %v1210_v38 = vmax.f32 %v1116_v31, 1e-30  ;;  %v1172_v56 = vadd.f32 %v1171_v51, %v1170_v43 }
 0x1f2   :  { %v1055_v39 = vrot.slane %v1054_v32, 1  ;;  %v1209_v40 = vmax.f32 %v1110_v7, 1e-30  ;;  %v1166_v58 = vadd.f32 %v1165_v55, %v1164_v47 }
 0x1f3   :  { %v1049_v41 = vrot.slane %v1048_v34, 1  ;;  %3117 = vrcp.f32 %v1210_v38 }
 0x1f4   :  { %v1056_v42 = vmax.f32 %v1054_v32, %v1055_v39  ;;  %3119 = vrcp.f32 %v1209_v40 }
 0x1f5   :  { %v1050_v46 = vmax.f32 %v1048_v34, %v1049_v41 }
 0x1f6   :  { %v1084_v48 = vsub.f32 %v750_v8, %v1056_v42 }
 0x1f7   :  { %v1083_v49 = vsub.f32 %v680_v13, %v1050_v46 }
 0x1f8   :  { %v1095_v50 = vmul.f32 1.442695, %v1084_v48 }
 0x1f9   :  { %v1093_v54 = vmul.f32 1.442695, %v1083_v49 }
 0x1fa   :  { %3121 = vpow2.f32 %v1095_v50 }
 0x1fb   :  { %3123 = vpow2.f32 %v1093_v54 }
 0x1fd   :  { %v3118_v57 = vpop.eup %3117 }
 0x1fe   :  { %v3120_v59 = vpop.eup %3119  ;;  %v1226_v60 = vmul.f32 %v3118_v57, %v1172_v56 }
 0x1ff   :  { %v1225_v61 = vmul.f32 %v3120_v59, %v1166_v58 }
 0x201   :  { %2703 = vmatprep.mubr.f32.mxu1 %v1225_v61 }
 0x202   :  { %2704 = vmatmul.mubr.f32.vlgmr.msra.gmra.mrb[0].mxu1 %v1226_v60 }
 0x204   :  { %v3122_v62 = vpop.eup %3121 }
 0x205   :  { %v3124_v63 = vpop.eup %3123  ;;  %v1123_v0 = vrot.slane %v3122_v62, 4  ;;  %v1156_v1 = vmul.f32 %v3122_v62, %v3449_v36 }
 0x206   :  { %v1117_v3 = vrot.slane %v3124_v63, 4  ;;  %v1155_v4 = vmul.f32 %v3124_v63, %v3453_v37 }
 0x207   :  { %v889_v5 = vpop.f32.mrb[12].mxu1  ;;  %v1124_v6 = vadd.f32 %v3122_v62, %v1123_v0  ;;  %v1179_v12 = vrot.slane %v1156_v1, 4 }
 0x208   :  { %v890_v8 = vadd.f32 %v889_v5, %v461_v25  ;;  %v819_v9 = vpop.f32.mrb[12].mxu0  ;;  %v2600_v10 = vpop.f32.mrb[13].mxu1  ;;  %v1118_v11 = vadd.f32 %v3124_v63, %v1117_v3  ;;  %v1173_v15 = vrot.slane %v1155_v4, 4 }
 0x209   :  { %v820_v13 = vadd.f32 %v819_v9, %v456_v2  ;;  %v2565_v14 = vpop.f32.mrb[13].mxu0  ;;  %v1125_v16 = vrot.slane %v1124_v6, 2  ;;  %v1180_v20 = vadd.f32 %v1179_v12, %v1156_v1  ;;  %v466_v25 = vpop.permute.xlu0 %465 }
 0x20a   :  { %v1063_v17 = vrot.slane %v890_v8, 4  ;;  %v1119_v26 = vrot.slane %v1118_v11, 2  ;;  %v1174_v37 = vadd.f32 %v1173_v15, %v1155_v4  ;;  %v471_v2 = vpop.permute.xlu1 %470 }
 0x20b   :  { %v1057_v18 = vrot.slane %v820_v13, 4  ;;  %v1126_v19 = vadd.f32 %v1125_v16, %v1124_v6  ;;  %v1181_v32 = vrot.slane %v1180_v20, 2 }
 0x20c   :  { %v1064_v36 = vmax.f32 %v890_v8, %v1063_v17  ;;  %v1120_v29 = vadd.f32 %v1119_v26, %v1118_v11  ;;  %v1175_v33 = vrot.slane %v1174_v37, 2 }
 0x20d   :  { %v1058_v21 = vmax.f32 %v820_v13, %v1057_v18  ;;  %v1127_v22 = vrot.slane %v1126_v19, 1  ;;  %v1182_v41 = vadd.f32 %v1181_v32, %v1180_v20 }
 0x20e   :  { %v1065_v23 = vrot.slane %v1064_v36, 2  ;;  %v1121_v24 = vrot.slane %v1120_v29, 1  ;;  %v1176_v43 = vadd.f32 %v1175_v33, %v1174_v37 }
 0x20f   :  { %v1059_v27 = vrot.slane %v1058_v21, 2  ;;  %v1128_v28 = vadd.f32 %v1127_v22, %v1126_v19  ;;  %v1183_v49 = vrot.slane %v1182_v41, 1 }
 0x210   :  { %v1066_v30 = vmax.f32 %v1064_v36, %v1065_v23  ;;  %v1122_v31 = vadd.f32 %v1121_v24, %v1120_v29  ;;  %v1177_v51 = vrot.slane %v1176_v43, 1 }
 0x211   :  { %v1060_v7 = vmax.f32 %v1058_v21, %v1059_v27  ;;  %v1212_v34 = vmax.f32 %v1128_v28, 1e-30  ;;  %v1184_v54 = vadd.f32 %v1183_v49, %v1182_v41 }
 0x212   :  { %v1067_v35 = vrot.slane %v1066_v30, 1  ;;  %v1211_v38 = vmax.f32 %v1122_v31, 1e-30  ;;  %v1178_v56 = vadd.f32 %v1177_v51, %v1176_v43 }
 0x213   :  { %v1061_v39 = vrot.slane %v1060_v7, 1  ;;  %3125 = vrcp.f32 %v1212_v34 }
 0x214   :  { %v1068_v40 = vmax.f32 %v1066_v30, %v1067_v35  ;;  %3127 = vrcp.f32 %v1211_v38 }
 0x215   :  { %v1062_v42 = vmax.f32 %v1060_v7, %v1061_v39 }
 0x216   :  { %v1086_v46 = vsub.f32 %v890_v8, %v1068_v40 }
 0x217   :  { %v1085_v47 = vsub.f32 %v820_v13, %v1062_v42 }
 0x218   :  { %v1099_v48 = vmul.f32 1.442695, %v1086_v46 }
 0x219   :  { %v1097_v50 = vmul.f32 1.442695, %v1085_v47 }
 0x21a   :  { %3129 = vpow2.f32 %v1099_v48 }
 0x21b   :  { %3131 = vpow2.f32 %v1097_v50 }
 0x21d   :  { %v3126_v55 = vpop.eup %3125 }
 0x21e   :  { %v3128_v57 = vpop.eup %3127  ;;  %v1228_v58 = vmul.f32 %v3126_v55, %v1184_v54 }
 0x21f   :  { %v1227_v59 = vmul.f32 %v3128_v57, %v1178_v56 }
 0x221   :  { %2706 = vmatprep.mubr.f32.mxu1 %v1227_v59 }
 0x222   :  { %2707 = vmatmul.mubr.f32.gmra.mrb[2].mxu1 %v1228_v58 }
 0x224   :  { %v3130_v60 = vpop.eup %3129 }
 0x225   :  { %v3132_v61 = vpop.eup %3131  ;;  %v1135_v62 = vrot.slane %v3130_v60, 4  ;;  %v1158_v63 = vmul.f32 %v3130_v60, %v3459_v44 }
 0x226   :  { %v1129_v0 = vrot.slane %v3132_v61, 4  ;;  %v1157_v1 = vmul.f32 %v3132_v61, %v3461_v45 }
 0x227   :  { %v1029_v3 = vpop.f32.mrb[14].mxu1  ;;  %v1136_v4 = vadd.f32 %v3130_v60, %v1135_v62  ;;  %v1191_v10 = vrot.slane %v1158_v63, 4 }
 0x228   :  { %v1030_v5 = vadd.f32 %v1029_v3, %v471_v2  ;;  %v959_v6 = vpop.f32.mrb[14].mxu0  ;;  %v2670_v8 = vpop.f32.mrb[15].mxu1  ;;  %v1130_v9 = vadd.f32 %v3132_v61, %v1129_v0  ;;  %v1185_v13 = vrot.slane %v1157_v1, 4 }
 0x229   :  { %v960_v11 = vadd.f32 %v959_v6, %v466_v25  ;;  %v2635_v12 = vpop.f32.mrb[15].mxu0  ;;  %v1137_v14 = vrot.slane %v1136_v4, 2  ;;  %v1192_v19 = vadd.f32 %v1191_v10, %v1158_v63 }
 0x22a   :  { %v1075_v15 = vrot.slane %v1030_v5, 4  ;;  %v1131_v16 = vrot.slane %v1130_v9, 2  ;;  %v1186_v36 = vadd.f32 %v1185_v13, %v1157_v1 }
 0x22b   :  { %v1069_v17 = vrot.slane %v960_v11, 4  ;;  %v1138_v44 = vadd.f32 %v1137_v14, %v1136_v4  ;;  %v1193_v27 = vrot.slane %v1192_v19, 2 }
 0x22c   :  { %v1076_v26 = vmax.f32 %v1030_v5, %v1075_v15  ;;  %v1132_v18 = vadd.f32 %v1131_v16, %v1130_v9  ;;  %v1187_v30 = vrot.slane %v1186_v36, 2  ;;  %v1360_v15 = vld [vmem:[%s3836_s4 + $0xd8] sm:$0xff]  ;;  %v1361_v16 = vld [vmem:[%s3836_s4 + $0xe0] sm:$0xff] }
 0x22d   :  { %v1070_v45 = vmax.f32 %v960_v11, %v1069_v17  ;;  %v1139_v29 = vrot.slane %v1138_v44, 1  ;;  %v1194_v35 = vadd.f32 %v1193_v27, %v1192_v19 }
 0x22e   :  { %v1077_v20 = vrot.slane %v1076_v26, 2  ;;  %v1133_v21 = vrot.slane %v1132_v18, 1  ;;  %v1188_v39 = vadd.f32 %v1187_v30, %v1186_v36 }
 0x22f   :  { %v1071_v37 = vrot.slane %v1070_v45, 2  ;;  %v1140_v22 = vadd.f32 %v1139_v29, %v1138_v44  ;;  %v1195_v43 = vrot.slane %v1194_v35, 1  ;;  %v3051_v44 = vpack.c.bf16 %v1361_v16, %v1360_v15 }
 0x230   :  { %v1078_v23 = vmax.f32 %v1076_v26, %v1077_v20  ;;  %v1134_v24 = vadd.f32 %v1133_v21, %v1132_v18  ;;  %v1189_v47 = vrot.slane %v1188_v39, 1 }
 0x231   :  { %v1072_v28 = vmax.f32 %v1070_v45, %v1071_v37  ;;  %v1214_v31 = vmax.f32 %v1140_v22, 1e-30  ;;  %v1196_v48 = vadd.f32 %v1195_v43, %v1194_v35  ;;  %3052 = vmatprep.subr.bf16.mxu0 %v3051_v44 }
 0x232   :  { %v1079_v32 = vrot.slane %v1078_v23, 1  ;;  %v1213_v7 = vmax.f32 %v1134_v24, 1e-30  ;;  %v1190_v50 = vadd.f32 %v1189_v47, %v1188_v39  ;;  %3054 = vmatpush3.bf16.msra.mxu0 %v3051_v44  ;;  %v1591_v47 = vld [vmem:[%s3837_s5 + $0x18] sm:$0xff] }
 0x233   :  { %v1073_v33 = vrot.slane %v1072_v28, 1  ;;  %3133 = vrcp.f32 %v1214_v31 }
 0x234   :  { %v1080_v34 = vmax.f32 %v1078_v23, %v1079_v32  ;;  %3135 = vrcp.f32 %v1213_v7 }
 0x235   :  { %v1074_v38 = vmax.f32 %v1072_v28, %v1073_v33 }
 0x236   :  { %v1088_v40 = vsub.f32 %v1030_v5, %v1080_v34 }
 0x237   :  { %v1087_v41 = vsub.f32 %v960_v11, %v1074_v38 }
 0x238   :  { %v1103_v42 = vmul.f32 1.442695, %v1088_v40 }
 0x239   :  { %v1101_v46 = vmul.f32 1.442695, %v1087_v41  ;;  %v1588_v41 = vld [vmem:[%s3837_s5] sm:$0xff] }
 0x23a   :  { %3137 = vpow2.f32 %v1103_v42  ;;  %v1589_v42 = vld [vmem:[%s3837_s5 + $0x8] sm:$0xff] }
 0x23b   :  { %3139 = vpow2.f32 %v1101_v46  ;;  %v3055_v43 = vpack.c.bf16 %v1589_v42, %v1588_v41  ;;  %v1590_v46 = vld [vmem:[%s3837_s5 + $0x10] sm:$0xff] }
 0x23d   :  { %v3134_v49 = vpop.eup %3133  ;;  %3056 = vmatprep.subr.bf16.mxu0 %v3055_v43 }
 0x23e   :  { %v3136_v51 = vpop.eup %3135  ;;  %v1230_v54 = vmul.f32 %v3134_v49, %v1196_v48  ;;  %v1592_v48 = vld [vmem:[%s3837_s5 + $0x20] sm:$0xff]  ;;  %v3059_v49 = vpack.c.bf16 %v1591_v47, %v1590_v46 }
 0x23f   :  { %v1229_v55 = vmul.f32 %v3136_v51, %v1190_v50  ;;  %v1593_v50 = vld [vmem:[%s3837_s5 + $0x28] sm:$0xff] }
 0x240   :  { %v3063_v51 = vpack.c.bf16 %v1593_v50, %v1592_v48 }
 0x241   :  { %2709 = vmatprep.mubr.f32.mxu1 %v1229_v55  ;;  %v1595_v55 = vld [vmem:[%s3837_s5 + $0x38] sm:$0xff] }
 0x242   :  { %2710 = vmatmul.mubr.f32.gmra.mrb[4].mxu1 %v1230_v54  ;;  %v1594_v54 = vld [vmem:[%s3837_s5 + $0x30] sm:$0xff] }
 0x244   :  { %v3138_v56 = vpop.eup %3137 }
 0x245   :  { %v3140_v57 = vpop.eup %3139  ;;  %v1147_v58 = vrot.slane %v3138_v56, 4  ;;  %v1160_v59 = vmul.f32 %v3138_v56, %v3465_v52 }
 0x246   :  { %v1141_v60 = vrot.slane %v3140_v57, 4  ;;  %v1159_v61 = vmul.f32 %v3140_v57, %v3467_v53 }
 0x247   :  { %v1148_v62 = vadd.f32 %v3138_v56, %v1147_v58  ;;  %v1203_v25 = vrot.slane %v1160_v59, 4  ;;  %v3067_v56 = vpack.c.bf16 %v1595_v55, %v1594_v54 }
 0x248   :  { %v1142_v63 = vadd.f32 %v3140_v57, %v1141_v60  ;;  %v1197_v0 = vrot.slane %v1159_v61, 4  ;;  %v1581_v60 = vld [vmem:[%s3836_s4 + $0xf0] sm:$0xff] }
 0x249   :  { %v1149_v1 = vrot.slane %v1148_v62, 2  ;;  %v1204_v5 = vadd.f32 %v1203_v25, %v1160_v59  ;;  %v1580_v59 = vld [vmem:[%s3836_s4 + $0xe8] sm:$0xff] }
 0x24a   :  { %v1143_v2 = vrot.slane %v1142_v63, 2  ;;  %v1198_v6 = vadd.f32 %v1197_v0, %v1159_v61  ;;  %v1582_v61 = vld [vmem:[%s3836_s4 + $0xf8] sm:$0xff]  ;;  %v1584_v0 = vld [vmem:[%s3836_s4 + $0x108] sm:$0xff] }
 0x24b   :  { %v1150_v3 = vadd.f32 %v1149_v1, %v1148_v62  ;;  %v1205_v12 = vrot.slane %v1204_v5, 2  ;;  %v1583_v62 = vld [vmem:[%s3836_s4 + $0x100] sm:$0xff]  ;;  %v1585_v1 = vld [vmem:[%s3836_s4 + $0x110] sm:$0xff] }
 0x24c   :  { %v1144_v4 = vadd.f32 %v1143_v2, %v1142_v63  ;;  %v1199_v13 = vrot.slane %v1198_v6, 2  ;;  %v3071_v63 = vpack.c.bf16 %v1581_v60, %v1580_v59  ;;  %v3075_v25 = vpack.c.bf16 %v1583_v62, %v1582_v61 }
 0x24d   :  { %v1151_v8 = vrot.slane %v1150_v3, 1  ;;  %v1206_v53 = vadd.f32 %v1205_v12, %v1204_v5  ;;  %v3079_v2 = vpack.c.bf16 %v1585_v1, %v1584_v0 }
 0x24e   :  { %v1145_v9 = vrot.slane %v1144_v4, 1  ;;  %v1200_v17 = vadd.f32 %v1199_v13, %v1198_v6  ;;  %3087 = vmatprep.subr.bf16.mxu1 %v3071_v63 }
 0x24f   :  { %v1152_v10 = vadd.f32 %v1151_v8, %v1150_v3  ;;  %v1207_v26 = vrot.slane %v1206_v53, 1  ;;  %3091 = vmatpush3.bf16.msra.mxu1 %v3071_v63 }
 0x250   :  { %v1146_v11 = vadd.f32 %v1145_v9, %v1144_v4  ;;  %v1201_v18 = vrot.slane %v1200_v17, 1  ;;  %3088 = vmatprep.subr.bf16.mxu1 %v3075_v25 }
 0x251   :  { %v1216_v52 = vmax.f32 %v1152_v10, 1e-30  ;;  %v1208_v19 = vadd.f32 %v1207_v26, %v1206_v53 }
 0x252   :  { %v1215_v14 = vmax.f32 %v1146_v11, 1e-30  ;;  %v1202_v36 = vadd.f32 %v1201_v18, %v1200_v17 }
 0x253   :  { %3141 = vrcp.f32 %v1216_v52  ;;  %3092 = vmatpush3.bf16.msra.mxu1 %v3075_v25 }
 0x254   :  { %3143 = vrcp.f32 %v1215_v14  ;;  %3089 = vmatprep.subr.bf16.mxu1 %v3079_v2 }
 0x257   :  { %3093 = vmatpush3.bf16.msra.mxu1 %v3079_v2 }
 0x25d   :  { %v3142_v45 = vpop.eup %3141 }
 0x25e   :  { %v3144_v29 = vpop.eup %3143  ;;  %v1232_v20 = vmul.f32 %v3142_v45, %v1208_v19 }
 0x25f   :  { %v1231_v21 = vmul.f32 %v3144_v29, %v1202_v36 }
 0x261   :  { %2712 = vmatprep.mubr.f32.mxu1 %v1231_v21 }
 0x262   :  { %2713 = vmatmul.mubr.f32.gmra.mrb[6].mxu1 %v1232_v20 }
 0x2d5   :  { %v3603_v37 = vpop.f32.mrb[0].mxu1 }
 0x2d6   :  { %v3605_v22 = vpop.f32.mrb[1].mxu1  ;;  %v1363_v24 = vmul.f32 %v3603_v37, %v3603_v37 }
 0x2d7   :  { %v1362_v23 = vmul.f32 %v3605_v22, %v3605_v22 }
 0x2d9   :  { %2731 = vmatprep.mubr.msk.f32.mxu0 %vm1370_vm2, %v1362_v23 }
 0x2da   :  { %2732 = vmatmul.mubr.msk.f32.vlgmr.msra.gmra.mrb[16].mxu0 %vm1370_vm2, %v1363_v24 }
 0x2db   :  { %3058 = vmatpush3.bf16.msra.mxu0 %v3055_v43 }
 0x2dc   :  { %3060 = vmatprep.subr.bf16.mxu0 %v3059_v49 }
 0x2df   :  { %3062 = vmatpush3.bf16.msra.mxu0 %v3059_v49 }
 0x2e0   :  { %3064 = vmatprep.subr.bf16.mxu0 %v3063_v51 }
 0x2e3   :  { %3066 = vmatpush3.bf16.msra.mxu0 %v3063_v51 }
 0x2e4   :  { %3068 = vmatprep.subr.bf16.mxu0 %v3067_v56 }
 0x2e7   :  { %3070 = vmatpush3.bf16.msra.mxu0 %v3067_v56 }
 0x2e8   :  { %3072 = vmatprep.subr.bf16.mxu0 %v3071_v63 }
 0x2f5   :  { %v3613_v27 = vpop.f32.mrb[2].mxu1 }
 0x2f6   :  { %v3615_v28 = vpop.f32.mrb[3].mxu1  ;;  %v1365_v31 = vmul.f32 %v3613_v27, %v3613_v27 }
 0x2f7   :  { %v1364_v30 = vmul.f32 %v3615_v28, %v3615_v28 }
 0x2f9   :  { %2734 = vmatprep.mubr.msk.f32.mxu0 %vm1370_vm2, %v1364_v30 }
 0x2fa   :  { %2735 = vmatmul.mubr.msk.f32.gmra.mrb[18].mxu0 %vm1370_vm2, %v1365_v31 }
 0x315   :  { %v3623_v32 = vpop.f32.mrb[4].mxu1 }
 0x316   :  { %v3625_v7 = vpop.f32.mrb[5].mxu1  ;;  %v1367_v34 = vmul.f32 %v3623_v32, %v3623_v32 }
 0x317   :  { %v1366_v33 = vmul.f32 %v3625_v7, %v3625_v7 }
 0x319   :  { %2737 = vmatprep.mubr.msk.f32.mxu0 %vm1370_vm2, %v1366_v33 }
 0x31a   :  { %2738 = vmatmul.mubr.msk.f32.gmra.mrb[20].mxu0 %vm1370_vm2, %v1367_v34 }
 0x335   :  { %v3633_v35 = vpop.f32.mrb[6].mxu1 }
 0x336   :  { %v3635_v38 = vpop.f32.mrb[7].mxu1  ;;  %v1369_v40 = vmul.f32 %v3633_v35, %v3633_v35 }
 0x337   :  { %v1368_v39 = vmul.f32 %v3635_v38, %v3635_v38 }
 0x339   :  { %2740 = vmatprep.mubr.msk.f32.mxu0 %vm1370_vm2, %v1368_v39 }
 0x33a   :  { %2741 = vmatmul.mubr.msk.f32.gmra.mrb[22].mxu0 %vm1370_vm2, %v1369_v40 }
 0x3ad   :  { %v2733_v57 = vpop.f32.mrb[16].mxu0 }
 0x3ae   :  { %3145 = vrsqrt.f32 %v2733_v57  ;;  %v1461_v58 = vpop.f32.mrb[17].mxu0  ;;  %vm1509_vm3 = vcmp.eq.f32.partialorder %v2733_v57, inf  ;;  %v1512_v6 = vand.u32 2147483648, %v2733_v57  ;;  %vm1511_vm4 = vcmp.eq.f32.partialorder %v2733_v57, 0.0 }
 0x3af   :  { %3147 = vrsqrt.f32 %v1461_v58  ;;  %vm1502_vm5 = vcmp.eq.f32.partialorder %v1461_v58, inf  ;;  %v1505_v10 = vand.u32 2147483648, %v1461_v58  ;;  %vm1504_vm6 = vcmp.eq.f32.partialorder %v1461_v58, 0.0 }
 0x3b8   :  { %v3146_v3 = vpop.eup %3145 }
 0x3b9   :  { %v3148_v4 = vpop.eup %3147  ;;  %v1508_v5 = vmul.f32 %v3146_v3, %v2733_v57 }
 0x3ba   :  { %v1501_v8 = vmul.f32 %v3148_v4, %v1461_v58 }
 0x3bb   :  { %v1510_v9 = vsel %vm1509_vm3, %v2733_v57, %v1508_v5 }
 0x3bc   :  { %v1513_v11 = vsel %vm1511_vm4, %v1512_v6, %v1510_v9  ;;  %v1503_v12 = vsel %vm1502_vm5, %v1461_v58, %v1501_v8  ;;  %v1586_v8 = vld [vmem:[%s3836_s4 + $0x118] sm:$0xff]  ;;  %v1587_v9 = vld [vmem:[%s3836_s4 + $0x120] sm:$0xff] }
 0x3bd   :  { %v1557_v13 = vadd.f32 0.001, %v1513_v11  ;;  %v1506_v52 = vsel %vm1504_vm6, %v1505_v10, %v1503_v12  ;;  %v3083_v10 = vpack.c.bf16 %v1587_v9, %v1586_v8 }
 0x3be   :  { %v1556_v14 = vadd.f32 0.001, %v1506_v52 }
 0x3bf   :  { %3149 = vrcp.f32 %v1557_v13  ;;  %3090 = vmatprep.subr.bf16.mxu1 %v3083_v10 }
 0x3c0   :  { %3151 = vrcp.f32 %v1556_v14  ;;  %3094 = vmatpush3.bf16.msra.mxu1 %v3083_v10  ;;  %v2095_v14 = vld [vmem:[%s3838_s6] ss:$0 sm:$0xff] }
 0x3c9   :  { %v3150_v53 = vpop.eup %3149 }
 0x3ca   :  { %v3152_v15 = vpop.eup %3151  ;;  %v3686_v16 = vmul.f32 %v3150_v53, %v3603_v37 }
 0x3cb   :  { %v3689_v17 = vmul.f32 %v3152_v15, %v3605_v22 }
 0x3cd   :  { %v2736_v44 = vpop.f32.mrb[18].mxu0  ;;  %2759 = vmatprep.mubr.msk.f32.mxu0 %vm1370_vm2, %v3689_v17 }
 0x3ce   :  { %3153 = vrsqrt.f32 %v2736_v44  ;;  %v1471_v26 = vpop.f32.mrb[19].mxu0  ;;  %2760 = vmatmul.mubr.msk.f32.vlgmr.msra.gmra.mrb[24].mxu0 %vm1370_vm2, %v3686_v16  ;;  %vm1523_vm7 = vcmp.eq.f32.partialorder %v2736_v44, inf  ;;  %v1526_v36 = vand.u32 2147483648, %v2736_v44  ;;  %vm1525_vm8 = vcmp.eq.f32.partialorder %v2736_v44, 0.0 }
 0x3cf   :  { %3155 = vrsqrt.f32 %v1471_v26  ;;  %3074 = vmatpush3.bf16.msra.mxu0 %v3071_v63  ;;  %vm1516_vm9 = vcmp.eq.f32.partialorder %v1471_v26, inf  ;;  %v1519_v21 = vand.u32 2147483648, %v1471_v26  ;;  %vm1518_vm10 = vcmp.eq.f32.partialorder %v1471_v26, 0.0 }
 0x3d0   :  { %3076 = vmatprep.subr.bf16.mxu0 %v3075_v25 }
 0x3d3   :  { %3078 = vmatpush3.bf16.msra.mxu0 %v3075_v25 }
 0x3d4   :  { %3080 = vmatprep.subr.bf16.mxu0 %v3079_v2 }
 0x3d7   :  { %3082 = vmatpush3.bf16.msra.mxu0 %v3079_v2 }
 0x3d8   :  { %v3154_v18 = vpop.eup %3153  ;;  %3084 = vmatprep.subr.bf16.mxu0 %v3083_v10 }
 0x3d9   :  { %v3156_v19 = vpop.eup %3155  ;;  %v1522_v45 = vmul.f32 %v3154_v18, %v2736_v44 }
 0x3da   :  { %v1515_v29 = vmul.f32 %v3156_v19, %v1471_v26 }
 0x3db   :  { %v1524_v20 = vsel %vm1523_vm7, %v2736_v44, %v1522_v45  ;;  %3086 = vmatpush3.bf16.msra.mxu0 %v3083_v10 }
 0x3dc   :  { %v1527_v37 = vsel %vm1525_vm8, %v1526_v36, %v1524_v20  ;;  %v1517_v22 = vsel %vm1516_vm9, %v1471_v26, %v1515_v29 }
 0x3dd   :  { %v1559_v23 = vadd.f32 0.001, %v1527_v37  ;;  %v1520_v24 = vsel %vm1518_vm10, %v1519_v21, %v1517_v22 }
 0x3de   :  { %v1558_v30 = vadd.f32 0.001, %v1520_v24 }
 0x3df   :  { %3157 = vrcp.f32 %v1559_v23 }
 0x3e0   :  { %3159 = vrcp.f32 %v1558_v30 }
 0x3e9   :  { %v3158_v31 = vpop.eup %3157 }
 0x3ea   :  { %v3160_v33 = vpop.eup %3159  ;;  %v3696_v34 = vmul.f32 %v3158_v31, %v3613_v27 }
 0x3eb   :  { %v3699_v39 = vmul.f32 %v3160_v33, %v3615_v28 }
 0x3ed   :  { %v2739_v40 = vpop.f32.mrb[20].mxu0  ;;  %2762 = vmatprep.mubr.msk.f32.mxu0 %vm1370_vm2, %v3699_v39 }
 0x3ee   :  { %3161 = vrsqrt.f32 %v2739_v40  ;;  %v1481_v41 = vpop.f32.mrb[21].mxu0  ;;  %2763 = vmatmul.mubr.msk.f32.gmra.mrb[26].mxu0 %vm1370_vm2, %v3696_v34  ;;  %vm1537_vm11 = vcmp.eq.f32.partialorder %v2739_v40, inf  ;;  %v1540_v47 = vand.u32 2147483648, %v2739_v40  ;;  %vm1539_vm12 = vcmp.eq.f32.partialorder %v2739_v40, 0.0 }
 0x3ef   :  { %3163 = vrsqrt.f32 %v1481_v41  ;;  %vm1530_vm13 = vcmp.eq.f32.partialorder %v1481_v41, inf  ;;  %v1533_v28 = vand.u32 2147483648, %v1481_v41  ;;  %vm1532_vm14 = vcmp.eq.f32.partialorder %v1481_v41, 0.0 }
 0x3f8   :  { %v3162_v42 = vpop.eup %3161 }
 0x3f9   :  { %v3164_v43 = vpop.eup %3163  ;;  %v1536_v46 = vmul.f32 %v3162_v42, %v2739_v40 }
 0x3fa   :  { %v1529_v27 = vmul.f32 %v3164_v43, %v1481_v41 }
 0x3fb   :  { %v1538_v48 = vsel %vm1537_vm11, %v2739_v40, %v1536_v46  ;;  %v2104_v46 = vld [vmem:[%s3839_s7] ss:$0 sm:$0xff]  ;;  %s3264_s7 = smov [#allocation5]  }
 0x3fc   :  { %v1541_v49 = vsel %vm1539_vm12, %v1540_v47, %v1538_v48  ;;  %v1531_v50 = vsel %vm1530_vm13, %v1481_v41, %v1529_v27  ;;  %s2059_s10 = sshll.u32 %s3264_s7, 4  ;;  %s2060_s10 = int_to_ptr.vmem [resolvable:$true] %s2059_s10 }
 0x3fd   :  { %v1561_v51 = vadd.f32 0.001, %v1541_v49  ;;  %v1534_v54 = vsel %vm1532_vm14, %v1533_v28, %v1531_v50  ;;  %s3231_s11 = scalar_lea.vmem %s2060_s10, 1024  ;;  %p3236_p9 = scmp.lt.s32.totalorder %s2060_s10, %s2060_s10 }
 0x3fe   :  { %v1560_v55 = vadd.f32 0.001, %v1534_v54  ;;  %p3232_p8 = scmp.ne.s32.totalorder %s2060_s10, %s3231_s11  ;;  %p3237_p10 = scmp.lt.s32.totalorder %s3231_s11, %s3231_s11 }
 0x3ff   :  { %3165 = vrcp.f32 %v1561_v51 }
 0x400   :  { %3167 = vrcp.f32 %v1560_v55  ;;  %p3238_p11 = por %p3237_p10, %p3236_p9 }
 0x402   :  { %p3239_p12 = pnand %p3238_p11, %p3232_p8 }
 0x409   :  { %v3166_v56 = vpop.eup %3165 }
 0x40a   :  { %v3168_v57 = vpop.eup %3167  ;;  %v3706_v58 = vmul.f32 %v3166_v56, %v3623_v32 }
 0x40b   :  { %v3709_v59 = vmul.f32 %v3168_v57, %v3625_v7 }
 0x40d   :  { %v2742_v60 = vpop.f32.mrb[22].mxu0  ;;  %2765 = vmatprep.mubr.msk.f32.mxu0 %vm1370_vm2, %v3709_v59 }
 0x40e   :  { %3169 = vrsqrt.f32 %v2742_v60  ;;  %v1491_v61 = vpop.f32.mrb[23].mxu0  ;;  %2766 = vmatmul.mubr.msk.f32.gmra.mrb[28].mxu0 %vm1370_vm2, %v3706_v58  ;;  %vm1551_vm15 = vcmp.eq.f32.partialorder %v2742_v60, inf  ;;  %v1554_v0 = vand.u32 2147483648, %v2742_v60  ;;  %vm1553_vm0 = vcmp.eq.f32.partialorder %v2742_v60, 0.0 }
 0x40f   :  { %3171 = vrsqrt.f32 %v1491_v61  ;;  %vm1544_vm1 = vcmp.eq.f32.partialorder %v1491_v61, inf  ;;  %v1547_v7 = vand.u32 2147483648, %v1491_v61  ;;  %vm1546_vm3 = vcmp.eq.f32.partialorder %v1491_v61, 0.0 }
 0x418   :  { %v3170_v62 = vpop.eup %3169 }
 0x419   :  { %v3172_v63 = vpop.eup %3171  ;;  %v1550_v25 = vmul.f32 %v3170_v62, %v2742_v60 }
 0x41a   :  { %v1543_v32 = vmul.f32 %v3172_v63, %v1491_v61 }
 0x41b   :  { %v1552_v1 = vsel %vm1551_vm15, %v2742_v60, %v1550_v25 }
 0x41c   :  { %v1555_v2 = vsel %vm1553_vm0, %v1554_v0, %v1552_v1  ;;  %v1545_v3 = vsel %vm1544_vm1, %v1491_v61, %v1543_v32 }
 0x41d   :  { %v1563_v4 = vadd.f32 0.001, %v1555_v2  ;;  %v1548_v5 = vsel %vm1546_vm3, %v1547_v7, %v1545_v3 }
 0x41e   :  { %v1562_v6 = vadd.f32 0.001, %v1548_v5 }
 0x41f   :  { %3173 = vrcp.f32 %v1563_v4 }
 0x420   :  { %3175 = vrcp.f32 %v1562_v6 }
 0x429   :  { %v3174_v11 = vpop.eup %3173 }
 0x42a   :  { %v3176_v12 = vpop.eup %3175  ;;  %v3722_v13 = vmul.f32 %v3174_v11, %v3633_v35 }
 0x42b   :  { %v3725_v52 = vmul.f32 %v3176_v12, %v3635_v38 }
 0x42d   :  { %2768 = vmatprep.mubr.msk.f32.mxu0 %vm1370_vm2, %v3725_v52 }
 0x42e   :  { %2769 = vmatmul.mubr.msk.f32.gmra.mrb[30].mxu0 %vm1370_vm2, %v3722_v13 }
 0x4a1   :  { %v2761_v53 = vpop.f32.mrb[24].mxu0 }
 0x4a2   :  { %v1699_v15 = vadd.f32 %v2761_v53, %v2095_v14  ;;  %v1693_v44 = vpop.f32.mrb[25].mxu0 }
 0x4a3   :  { %v1694_v26 = vadd.f32 %v2095_v14, %v1693_v44 }
 0x4a4   :  { %v1733_v35 = vmax.f32 %v1699_v15, 0.0 }
 0x4a5   :  { %v1732_v18 = vmax.f32 %v1694_v26, 0.0 }
 0x4a7   :  { %2787 = vmatprep.mubr.msk.f32.mxu0 %vm1370_vm2, %v1732_v18 }
 0x4a8   :  { %2788 = vmatmul.mubr.msk.f32.vlgmr.msra.gmra.mrb[32].mxu0 %vm1370_vm2, %v1733_v35 }
 0x4c1   :  { %v2764_v38 = vpop.f32.mrb[26].mxu0 }
 0x4c2   :  { %v1709_v19 = vadd.f32 %v2764_v38, %v2095_v14  ;;  %v1703_v45 = vpop.f32.mrb[27].mxu0 }
 0x4c3   :  { %v1704_v36 = vadd.f32 %v2095_v14, %v1703_v45 }
 0x4c4   :  { %v1735_v20 = vmax.f32 %v1709_v19, 0.0 }
 0x4c5   :  { %v1734_v29 = vmax.f32 %v1704_v36, 0.0 }
 0x4c7   :  { %2790 = vmatprep.mubr.msk.f32.mxu0 %vm1370_vm2, %v1734_v29 }
 0x4c8   :  { %2791 = vmatmul.mubr.msk.f32.gmra.mrb[34].mxu0 %vm1370_vm2, %v1735_v20 }
 0x4e1   :  { %v2767_v21 = vpop.f32.mrb[28].mxu0 }
 0x4e2   :  { %v1719_v37 = vadd.f32 %v2767_v21, %v2095_v14  ;;  %v1713_v22 = vpop.f32.mrb[29].mxu0 }
 0x4e3   :  { %v1714_v23 = vadd.f32 %v2095_v14, %v1713_v22 }
 0x4e4   :  { %v1737_v30 = vmax.f32 %v1719_v37, 0.0 }
 0x4e5   :  { %v1736_v24 = vmax.f32 %v1714_v23, 0.0 }
 0x4e7   :  { %2793 = vmatprep.mubr.msk.f32.mxu1 %vm1370_vm2, %v1736_v24 }
 0x4e8   :  { %2794 = vmatmul.mubr.msk.f32.vlgmr.msra.gmra.mrb[16].mxu1 %vm1370_vm2, %v1737_v30 }
 0x501   :  { %v2770_v31 = vpop.f32.mrb[30].mxu0 }
 0x502   :  { %v1729_v33 = vadd.f32 %v2770_v31, %v2095_v14  ;;  %v1723_v40 = vpop.f32.mrb[31].mxu0 }
 0x503   :  { %v1724_v41 = vadd.f32 %v2095_v14, %v1723_v40 }
 0x504   :  { %v1739_v43 = vmax.f32 %v1729_v33, 0.0 }
 0x505   :  { %v1738_v42 = vmax.f32 %v1724_v41, 0.0 }
 0x507   :  { %2796 = vmatprep.mubr.msk.f32.mxu1 %vm1370_vm2, %v1738_v42 }
 0x508   :  { %2797 = vmatmul.mubr.msk.f32.gmra.mrb[18].mxu1 %vm1370_vm2, %v1739_v43 }
 0x57b   :  { %v2789_v47 = vpop.f32.mrb[32].mxu0 }
 0x57c   :  { %v1843_v27 = vadd.f32 %v2789_v47, %v2104_v46  ;;  %v1837_v48 = vpop.f32.mrb[33].mxu0 }
 0x57d   :  { %v1838_v28 = vadd.f32 %v2104_v46, %v1837_v48 }
 0x57e   :  { %v1877_v49 = vadd.f32 %v1843_v27, %v3686_v16 }
 0x57f   :  { %v1876_v50 = vadd.f32 %v1838_v28, %v3689_v17 }
 0x580   :  { %v1887_v51 = vsel %vm1370_vm2, %v1877_v49, 0.0 }
 0x581   :  { %1888 = vadd.xlane.f32.xlu1 %v1887_v51  ;;  %v1884_v54 = vsel %vm1370_vm2, %v1876_v50, 0.0 }
 0x582   :  { %1885 = vadd.xlane.f32.xlu0 %v1884_v54 }
 0x59b   :  { %v2792_v55 = vpop.f32.mrb[34].mxu0 }
 0x59c   :  { %v1853_v56 = vadd.f32 %v2792_v55, %v2104_v46  ;;  %v1847_v57 = vpop.f32.mrb[35].mxu0 }
 0x59d   :  { %v1848_v60 = vadd.f32 %v2104_v46, %v1847_v57 }
 0x59e   :  { %v1879_v61 = vadd.f32 %v1853_v56, %v3696_v34 }
 0x59f   :  { %v1878_v63 = vadd.f32 %v1848_v60, %v3699_v39 }
 0x5a0   :  { %v1893_v62 = vsel %vm1370_vm2, %v1879_v61, 0.0 }
 0x5a1   :  { %1894 = vadd.xlane.f32.xlu0 %v1893_v62  ;;  %v1890_v16 = vsel %vm1370_vm2, %v1878_v63, 0.0 }
 0x5a5   :  { %1891 = vadd.xlane.f32.xlu0 %v1890_v16 }
 0x5bb   :  { %v2795_v17 = vpop.f32.mrb[16].mxu1 }
 0x5bc   :  { %v1863_v25 = vadd.f32 %v2795_v17, %v2104_v46  ;;  %v1857_v0 = vpop.f32.mrb[17].mxu1 }
 0x5bd   :  { %v1858_v32 = vadd.f32 %v2104_v46, %v1857_v0 }
 0x5be   :  { %v1881_v1 = vadd.f32 %v1863_v25, %v3706_v58 }
 0x5bf   :  { %v1880_v7 = vadd.f32 %v1858_v32, %v3709_v59 }
 0x5c0   :  { %v1899_v2 = vsel %vm1370_vm2, %v1881_v1, 0.0 }
 0x5c1   :  { %1900 = vadd.xlane.f32.xlu0 %v1899_v2  ;;  %v1896_v34 = vsel %vm1370_vm2, %v1880_v7, 0.0 }
 0x5c2   :  { %1897 = vadd.xlane.f32.xlu1 %v1896_v34 }
 0x5db   :  { %v2798_v3 = vpop.f32.mrb[18].mxu1 }
 0x5dc   :  { %v1873_v39 = vadd.f32 %v2798_v3, %v2104_v46  ;;  %v1867_v4 = vpop.f32.mrb[19].mxu1 }
 0x5dd   :  { %v1868_v5 = vadd.f32 %v2104_v46, %v1867_v4 }
 0x5de   :  { %v1883_v6 = vadd.f32 %v1873_v39, %v3722_v13 }
 0x5df   :  { %v1882_v8 = vadd.f32 %v1868_v5, %v3725_v52 }
 0x5e0   :  { %v1905_v9 = vsel %vm1370_vm2, %v1883_v6, 0.0 }
 0x5e1   :  { %1906 = vadd.xlane.f32.xlu0 %v1905_v9  ;;  %v1902_v58 = vsel %vm1370_vm2, %v1882_v8, 0.0 }
 0x5e2   :  { %1903 = vadd.xlane.f32.xlu1 %v1902_v58 }
 0x60e   :  { %v1889_v59 = vpop.xlane.xlu1 %1888 }
 0x60f   :  { %v1910_v10 = vmul.f32 0.015625, %v1889_v59  ;;  %v1886_v11 = vpop.xlane.xlu0 %1885 }
 0x610   :  { %v1909_v12 = vmul.f32 0.015625, %v1886_v11 }
 0x611   :  { %v3761_v14 = vsub.f32 %v1877_v49, %v1910_v10 }
 0x612   :  { %v3763_v53 = vsub.f32 %v1876_v50, %v1909_v12 }
 0x613   :  { %v1926_v15 = vmul.f32 %v3761_v14, %v3761_v14 }
 0x614   :  { %v1925_v13 = vmul.f32 %v3763_v53, %v3763_v53 }
 0x615   :  { %v1936_v52 = vsel %vm1370_vm2, %v1926_v15, 0.0 }
 0x616   :  { %1937 = vadd.xlane.f32.xlu0 %v1936_v52  ;;  %v1933_v44 = vsel %vm1370_vm2, %v1925_v13, 0.0 }
 0x617   :  { %1934 = vadd.xlane.f32.xlu1 %v1933_v44 }
 0x62e   :  { %v1895_v26 = vpop.xlane.xlu0 %1894 }
 0x62f   :  { %v1912_v18 = vmul.f32 0.015625, %v1895_v26 }
 0x631   :  { %v3771_v35 = vsub.f32 %v1879_v61, %v1912_v18 }
 0x632   :  { %v1892_v38 = vpop.xlane.xlu0 %1891 }
 0x633   :  { %v1911_v19 = vmul.f32 0.015625, %v1892_v38  ;;  %v1928_v45 = vmul.f32 %v3771_v35, %v3771_v35 }
 0x635   :  { %v3775_v36 = vsub.f32 %v1878_v63, %v1911_v19  ;;  %v1942_v29 = vsel %vm1370_vm2, %v1928_v45, 0.0 }
 0x636   :  { %1943 = vadd.xlane.f32.xlu0 %v1942_v29 }
 0x637   :  { %v1927_v20 = vmul.f32 %v3775_v36, %v3775_v36 }
 0x639   :  { %v1939_v21 = vsel %vm1370_vm2, %v1927_v20, 0.0 }
 0x63a   :  { %1940 = vadd.xlane.f32.xlu1 %v1939_v21 }
 0x64e   :  { %v1901_v37 = vpop.xlane.xlu0 %1900 }
 0x64f   :  { %v1914_v22 = vmul.f32 0.015625, %v1901_v37  ;;  %v1898_v23 = vpop.xlane.xlu1 %1897 }
 0x650   :  { %v1913_v24 = vmul.f32 0.015625, %v1898_v23 }
 0x651   :  { %v3781_v30 = vsub.f32 %v1881_v1, %v1914_v22 }
 0x652   :  { %v3783_v31 = vsub.f32 %v1880_v7, %v1913_v24 }
 0x653   :  { %v1930_v33 = vmul.f32 %v3781_v30, %v3781_v30 }
 0x654   :  { %v1929_v40 = vmul.f32 %v3783_v31, %v3783_v31 }
 0x655   :  { %v1948_v41 = vsel %vm1370_vm2, %v1930_v33, 0.0 }
 0x656   :  { %1949 = vadd.xlane.f32.xlu0 %v1948_v41  ;;  %v1945_v42 = vsel %vm1370_vm2, %v1929_v40, 0.0 }
 0x657   :  { %1946 = vadd.xlane.f32.xlu1 %v1945_v42 }
 0x66e   :  { %v1907_v43 = vpop.xlane.xlu0 %1906 }
 0x66f   :  { %v1916_v46 = vmul.f32 0.015625, %v1907_v43  ;;  %v1904_v47 = vpop.xlane.xlu1 %1903 }
 0x670   :  { %v1915_v27 = vmul.f32 0.015625, %v1904_v47 }
 0x671   :  { %v3791_v48 = vsub.f32 %v1883_v6, %v1916_v46 }
 0x672   :  { %v3793_v28 = vsub.f32 %v1882_v8, %v1915_v27 }
 0x673   :  { %v1932_v49 = vmul.f32 %v3791_v48, %v3791_v48 }
 0x674   :  { %v1931_v50 = vmul.f32 %v3793_v28, %v3793_v28 }
 0x675   :  { %v1954_v51 = vsel %vm1370_vm2, %v1932_v49, 0.0 }
 0x676   :  { %1955 = vadd.xlane.f32.xlu0 %v1954_v51  ;;  %v1951_v54 = vsel %vm1370_vm2, %v1931_v50, 0.0 }
 0x677   :  { %1952 = vadd.xlane.f32.xlu1 %v1951_v54 }
 0x6a3   :  { %v1938_v55 = vpop.xlane.xlu0 %1937 }
 0x6a4   :  { %v1959_v56 = vmul.f32 0.015873017, %v1938_v55  ;;  %v1935_v57 = vpop.xlane.xlu1 %1934 }
 0x6a5   :  { %v1958_v60 = vmul.f32 0.015873017, %v1935_v57 }
 0x6a6   :  { %3177 = vrsqrt.f32 %v1959_v56  ;;  %vm1975_vm4 = vcmp.eq.f32.partialorder %v1959_v56, inf  ;;  %v1978_v16 = vand.u32 2147483648, %v1959_v56  ;;  %vm1977_vm5 = vcmp.eq.f32.partialorder %v1959_v56, 0.0 }
 0x6a7   :  { %3179 = vrsqrt.f32 %v1958_v60  ;;  %vm1968_vm6 = vcmp.eq.f32.partialorder %v1958_v60, inf  ;;  %v1971_v0 = vand.u32 2147483648, %v1958_v60  ;;  %vm1970_vm7 = vcmp.eq.f32.partialorder %v1958_v60, 0.0 }
 0x6b0   :  { %v3178_v61 = vpop.eup %3177 }
 0x6b1   :  { %v3180_v62 = vpop.eup %3179  ;;  %v1974_v63 = vmul.f32 %v3178_v61, %v1959_v56 }
 0x6b2   :  { %v1967_v17 = vmul.f32 %v3180_v62, %v1958_v60 }
 0x6b3   :  { %v1976_v25 = vsel %vm1975_vm4, %v1959_v56, %v1974_v63 }
 0x6b4   :  { %v1979_v32 = vsel %vm1977_vm5, %v1978_v16, %v1976_v25  ;;  %v1969_v1 = vsel %vm1968_vm6, %v1958_v60, %v1967_v17 }
 0x6b5   :  { %v2023_v7 = vadd.f32 0.001, %v1979_v32  ;;  %v1972_v2 = vsel %vm1970_vm7, %v1971_v0, %v1969_v1 }
 0x6b6   :  { %v2022_v34 = vadd.f32 0.001, %v1972_v2 }
 0x6b7   :  { %3181 = vrcp.f32 %v2023_v7 }
 0x6b8   :  { %3183 = vrcp.f32 %v2022_v34 }
 0x6c1   :  { %v3182_v3 = vpop.eup %3181 }
 0x6c2   :  { %v3184_v39 = vpop.eup %3183  ;;  %v2039_v4 = vmul.f32 %v3182_v3, %v3761_v14 }
 0x6c3   :  { %v1944_v5 = vpop.xlane.xlu0 %1943  ;;  %v2038_v6 = vmul.f32 %v3184_v39, %v3763_v53 }
 0x6c4   :  { %v1961_v8 = vmul.f32 0.015873017, %v1944_v5  ;;  %2047 = vst.msk [vmem:[#allocation5 + $0x8] sm:$0xff] %vm1370_vm2, %v2039_v4 }
 0x6c5   :  { %2046 = vst.msk [vmem:[#allocation5] sm:$0xff] %vm1370_vm2, %v2038_v6 }
 0x6c6   :  { %3185 = vrsqrt.f32 %v1961_v8  ;;  %vm1989_vm8 = vcmp.eq.f32.partialorder %v1961_v8, inf  ;;  %v1992_v11 = vand.u32 2147483648, %v1961_v8  ;;  %vm1991_vm9 = vcmp.eq.f32.partialorder %v1961_v8, 0.0 }
 0x6c7   :  { %v1941_v9 = vpop.xlane.xlu1 %1940 }
 0x6c8   :  { %v1960_v58 = vmul.f32 0.015873017, %v1941_v9 }
 0x6ca   :  { %3187 = vrsqrt.f32 %v1960_v58  ;;  %vm1982_vm10 = vcmp.eq.f32.partialorder %v1960_v58, inf  ;;  %v1985_v53 = vand.u32 2147483648, %v1960_v58  ;;  %vm1984_vm11 = vcmp.eq.f32.partialorder %v1960_v58, 0.0 }
 0x6d0   :  { %v3186_v59 = vpop.eup %3185 }
 0x6d1   :  { %v1988_v10 = vmul.f32 %v3186_v59, %v1961_v8 }
 0x6d3   :  { %v1990_v12 = vsel %vm1989_vm8, %v1961_v8, %v1988_v10 }
 0x6d4   :  { %v3188_v15 = vpop.eup %3187  ;;  %v1993_v14 = vsel %vm1991_vm9, %v1992_v11, %v1990_v12 }
 0x6d5   :  { %v2025_v13 = vadd.f32 0.001, %v1993_v14  ;;  %v1981_v52 = vmul.f32 %v3188_v15, %v1960_v58 }
 0x6d7   :  { %3189 = vrcp.f32 %v2025_v13  ;;  %v1983_v44 = vsel %vm1982_vm10, %v1960_v58, %v1981_v52 }
 0x6d8   :  { %v1986_v26 = vsel %vm1984_vm11, %v1985_v53, %v1983_v44 }
 0x6d9   :  { %v2024_v18 = vadd.f32 0.001, %v1986_v26 }
 0x6db   :  { %3191 = vrcp.f32 %v2024_v18 }
 0x6e1   :  { %v3190_v38 = vpop.eup %3189 }
 0x6e2   :  { %v2041_v19 = vmul.f32 %v3190_v38, %v3771_v35 }
 0x6e3   :  { %v1950_v45 = vpop.xlane.xlu0 %1949 }
 0x6e4   :  { %v1963_v29 = vmul.f32 0.015873017, %v1950_v45  ;;  %v1947_v20 = vpop.xlane.xlu1 %1946  ;;  %2049 = vst.msk [vmem:[#allocation5 + $0x18] sm:$0xff] %vm1370_vm2, %v2041_v19 }
 0x6e5   :  { %v3192_v21 = vpop.eup %3191  ;;  %v1962_v37 = vmul.f32 0.015873017, %v1947_v20 }
 0x6e6   :  { %3193 = vrsqrt.f32 %v1963_v29  ;;  %v2040_v22 = vmul.f32 %v3192_v21, %v3775_v36  ;;  %vm2003_vm12 = vcmp.eq.f32.partialorder %v1963_v29, inf  ;;  %v2006_v40 = vand.u32 2147483648, %v1963_v29 }
 0x6e7   :  { %3195 = vrsqrt.f32 %v1962_v37  ;;  %vm2005_vm13 = vcmp.eq.f32.partialorder %v1963_v29, 0.0  ;;  %vm1996_vm14 = vcmp.eq.f32.partialorder %v1962_v37, inf  ;;  %v1999_v42 = vand.u32 2147483648, %v1962_v37 }
 0x6e8   :  { %2048 = vst.msk [vmem:[#allocation5 + $0x10] sm:$0xff] %vm1370_vm2, %v2040_v22  ;;  %vm1998_vm15 = vcmp.eq.f32.partialorder %v1962_v37, 0.0 }
 0x6f0   :  { %v3194_v23 = vpop.eup %3193 }
 0x6f1   :  { %v3196_v24 = vpop.eup %3195  ;;  %v2002_v33 = vmul.f32 %v3194_v23, %v1963_v29 }
 0x6f2   :  { %v1995_v41 = vmul.f32 %v3196_v24, %v1962_v37 }
 0x6f3   :  { %v2004_v35 = vsel %vm2003_vm12, %v1963_v29, %v2002_v33 }
 0x6f4   :  { %v2007_v43 = vsel %vm2005_vm13, %v2006_v40, %v2004_v35  ;;  %v1997_v46 = vsel %vm1996_vm14, %v1962_v37, %v1995_v41 }
 0x6f5   :  { %v2027_v47 = vadd.f32 0.001, %v2007_v43  ;;  %v2000_v27 = vsel %vm1998_vm15, %v1999_v42, %v1997_v46 }
 0x6f6   :  { %v2026_v49 = vadd.f32 0.001, %v2000_v27 }
 0x6f7   :  { %3197 = vrcp.f32 %v2027_v47 }
 0x6f8   :  { %3199 = vrcp.f32 %v2026_v49 }
 0x701   :  { %v3198_v36 = vpop.eup %3197 }
 0x702   :  { %v3200_v50 = vpop.eup %3199  ;;  %v2043_v51 = vmul.f32 %v3198_v36, %v3781_v30 }
 0x703   :  { %v1956_v54 = vpop.xlane.xlu0 %1955  ;;  %v2042_v55 = vmul.f32 %v3200_v50, %v3783_v31 }
 0x704   :  { %v1965_v56 = vmul.f32 0.015873017, %v1956_v54  ;;  %v1953_v57 = vpop.xlane.xlu1 %1952  ;;  %2051 = vst.msk [vmem:[#allocation5 + $0x28] sm:$0xff] %vm1370_vm2, %v2043_v51 }
 0x705   :  { %v1964_v60 = vmul.f32 0.015873017, %v1953_v57  ;;  %2050 = vst.msk [vmem:[#allocation5 + $0x20] sm:$0xff] %vm1370_vm2, %v2042_v55 }
 0x706   :  { %3201 = vrsqrt.f32 %v1965_v56  ;;  %vm2017_vm0 = vcmp.eq.f32.partialorder %v1965_v56, inf  ;;  %v2020_v16 = vand.u32 2147483648, %v1965_v56  ;;  %vm2019_vm1 = vcmp.eq.f32.partialorder %v1965_v56, 0.0 }
 0x707   :  { %3203 = vrsqrt.f32 %v1964_v60  ;;  %vm2010_vm3 = vcmp.eq.f32.partialorder %v1964_v60, inf  ;;  %v2013_v30 = vand.u32 2147483648, %v1964_v60  ;;  %vm2012_vm4 = vcmp.eq.f32.partialorder %v1964_v60, 0.0 }
 0x710   :  { %v3202_v61 = vpop.eup %3201 }
 0x711   :  { %v3204_v62 = vpop.eup %3203  ;;  %v2016_v63 = vmul.f32 %v3202_v61, %v1965_v56 }
 0x712   :  { %v2009_v17 = vmul.f32 %v3204_v62, %v1964_v60 }
 0x713   :  { %v2018_v25 = vsel %vm2017_vm0, %v1965_v56, %v2016_v63 }
 0x714   :  { %v2021_v31 = vsel %vm2019_vm1, %v2020_v16, %v2018_v25  ;;  %v2011_v0 = vsel %vm2010_vm3, %v1964_v60, %v2009_v17 }
 0x715   :  { %v2029_v32 = vadd.f32 0.001, %v2021_v31  ;;  %v2014_v1 = vsel %vm2012_vm4, %v2013_v30, %v2011_v0 }
 0x716   :  { %v2028_v7 = vadd.f32 0.001, %v2014_v1 }
 0x717   :  { %3205 = vrcp.f32 %v2029_v32 }
 0x718   :  { %3207 = vrcp.f32 %v2028_v7 }
 0x721   :  { %v3206_v2 = vpop.eup %3205 }
 0x722   :  { %v3208_v34 = vpop.eup %3207  ;;  %v2045_v3 = vmul.f32 %v3206_v2, %v3791_v48 }
 0x723   :  { %v2044_v39 = vmul.f32 %v3208_v34, %v3793_v28 }
 0x724   :  { %2053 = vst.msk [vmem:[#allocation5 + $0x38] sm:$0xff] %vm1370_vm2, %v2045_v3 }
 0x725   :  { %2052 = vst.msk [vmem:[#allocation5 + $0x30] sm:$0xff] %vm1370_vm2, %v2044_v39 }
 0x726   :  { %3242 = shalt.err (!%p3239_p12)
}
 0x727   :  { %s3243_s14 = scalar_lea.hbm %s3840_s8, 1024 }
 0x728   :  { %p3244_p13 = scmp.ne.s32.totalorder %s3840_s8, %s3243_s14  ;;  %p3247_p0 = scmp.lt.u32.totalorder %s3243_s14, %s3840_s8 }
 0x72a   :  { %p3249_p1 = pnand %p3247_p0, %p3244_p13 }
 0x72c   :  { %3252 = shalt.err (!%p3249_p1)
}
 0x72d   :  { %2065 = dma.vmem_to_hbm [thread:$0]  %s2060_s10, 1024, %s3840_s8, [#allocation4], %s3258_s15, %s3258_s15, %s3259_s16  }
 0x72e   :  { %3255 = dma.done.wait [#allocation4], 1024  }
 0x72f   :  { %3256 = vsyncadd [#allocation4], 4294966272 }
 0x730   :  { %2069 = vsyncpa [#allocation3], 1 }
 0x731   :  { %2070 = vsyncpa [#allocation4], 1 }

</bundles_post_ra>
